<compile_context>
chip_gen: v5e
topology: v5e:2x2
jax: 0.10.0
libtpu: 0.0.40
codegen_flags: <defaults>
</compile_context>

<pallas_src>
import inspect

import numpy as np

import jax
import jax.numpy as jnp
from jax import lax
from jax.experimental import pallas as pl
from jax.experimental.pallas import tpu as pltpu

# per-step schedule flags (bit-packed into one SMEM int32 per grid step)
_INIT = 1    # first step of this node tile  -> zero the accumulator
_FINAL = 2   # last step of this node tile   -> project + MLPs + residual, write out
_VALID = 4   # step carries a real edge block -> accumulate


def _round_up(a: int, b: int) -> int:
    return (a + b - 1) // b * b


def _supports_pipeline_mode() -> bool:
    if not hasattr(pl, "Buffered"):
        return False
    try:
        return "pipeline_mode" in inspect.signature(pl.BlockSpec).parameters
    except (TypeError, ValueError):
        return False


def _spherenet_stack_kernel(tile_ref, blk_ref, flags_ref,        # scalar prefetch (SMEM)
                            x_ref, ef_ref, row_ref,              # tiled inputs
                            we_ref, w1_ref, b1_ref, w2_ref, b2_ref,  # resident weights
                            out_ref,                             # output node tile
                            acc_ref):                            # (tn, k_pad) f32 scratch
    t = pl.program_id(0)
    flags = flags_ref[t]
    tile = tile_ref[t]
    del blk_ref  # only used by the index_maps

    tn, k_pad = acc_ref.shape
    te = ef_ref.shape[0]
    L, D, _ = w1_ref.shape

    is_init = (flags & _INIT) != 0
    is_final = (flags & _FINAL) != 0
    is_valid = (flags & _VALID) != 0

    @pl.when(is_init)
    def _init():
        acc_ref[...] = jnp.zeros_like(acc_ref)

    @pl.when(is_valid)
    def _accumulate():
        # scatter-add (torch index_add_) of the raw edge features as a block-local
        # one-hot matmul on the MXU.  Out-of-tile / padded / sentinel rows compare
        # unequal and are dropped.  The trailing "1" feature column aggregates to
        # the node degree, which later multiplies the folded edge bias.
        local = lax.broadcasted_iota(jnp.int32, (tn, te), 0) + tile * tn
        onehot = (local == row_ref[...]).astype(jnp.bfloat16)        # (tn, te)
        acc_ref[...] += jnp.dot(onehot, ef_ref[...],
                                preferred_element_type=jnp.float32)  # (tn, k_pad) f32

    @pl.when(is_final)
    def _finalize():
        # One edge projection for all layers: (tn, k_pad) @ (k_pad, L*D).
        feat = acc_ref[...].astype(jnp.bfloat16)
        msg = jnp.dot(feat, we_ref[...],
                      preferred_element_type=jnp.float32)            # (tn, L*D) f32
        x = x_ref[...]
        for l in range(L):                                           # static unroll
            agg = msg[:, l * D:(l + 1) * D]
            h = jnp.dot(agg.astype(jnp.bfloat16), w1_ref[l],
                        preferred_element_type=jnp.float32) + b1_ref[l]
            h = jnp.maximum(h, 0.0)
            x = x + jnp.dot(h.astype(jnp.bfloat16), w2_ref[l],
                            preferred_element_type=jnp.float32) + b2_ref[l]
        out_ref[...] = x


def prepare_graph(edge_index, rbf_feature, angle_feature, num_nodes,
                  *, node_tile=128, edge_tile=256):
    """Sort edges by destination node and build the flattened (tile, block) schedule.

    The graph is layer-invariant in SimpleSphereNetModel, so this host-side prep is
    done once and reused by the fused layer stack.
    """
    edge_index = np.asarray(edge_index)
    rbf = np.asarray(rbf_feature, np.float32)
    ang = np.asarray(angle_feature, np.float32)
    E, rbf_dim = rbf.shape
    angle_dim = ang.shape[1]
    k_in = rbf_dim + angle_dim

    n_pad = _round_up(max(num_nodes, node_tile), node_tile)
    e_pad = _round_up(max(E, edge_tile), edge_tile)
    k_pad = _round_up(k_in + 1, 128)         # +1 bias column; pad K to the MXU width
    n_tiles = n_pad // node_tile
    n_eb = e_pad // edge_tile

    # edge features: [rbf | angle | 1 (bias/degree column) | 0-pad]
    ef = np.zeros((e_pad, k_pad), np.float32)
    ef[:E, :rbf_dim] = rbf
    ef[:E, rbf_dim:k_in] = ang
    ef[:E, k_in] = 1.0

    # pad destination rows with an out-of-range sentinel, then sort by destination
    row = np.full((e_pad,), n_pad, np.int32)
    row[:E] = edge_index[0].astype(np.int32)
    order = np.argsort(row, kind="stable")
    row_s = row[order]
    ef_s = ef[order]

    # per-node-tile contiguous edge range -> list of active (tile, block) steps
    lo = np.arange(n_tiles, dtype=np.int64) * node_tile
    starts = np.searchsorted(row_s, lo, side="left")
    ends = np.searchsorted(row_s, lo + node_tile, side="left")

    sched_tile, sched_blk, sched_flags = [], [], []
    n_valid_steps = 0
    for i in range(n_tiles):
        s, e = int(starts[i]), int(ends[i])
        if e > s:
            blocks = list(range(s // edge_tile, (e - 1) // edge_tile + 1))
            valid = _VALID
            n_valid_steps += len(blocks)
        else:
            # empty segment: one dummy step so the tile is still initialized,
            # finalized and written (isolated nodes get x + MLP(0)).
            blocks = [min(s // edge_tile, n_eb - 1)]
            valid = 0
        for j, b in enumerate(blocks):
            f = valid
            if j == 0:
                f |= _INIT
            if j == len(blocks) - 1:
                f |= _FINAL
            sched_tile.append(i)
            sched_blk.append(b)
            sched_flags.append(f)

    return dict(
        ef=jnp.asarray(ef_s, jnp.bfloat16),
        row=jnp.asarray(row_s.reshape(1, e_pad), jnp.int32),
        sched_tile=jnp.asarray(sched_tile, jnp.int32),
        sched_blk=jnp.asarray(sched_blk, jnp.int32),
        sched_flags=jnp.asarray(sched_flags, jnp.int32),
        n_pad=n_pad, e_pad=e_pad, k_pad=k_pad, k_in=k_in,
        node_tile=node_tile, edge_tile=edge_tile,
        n_tiles=n_tiles, n_eb=n_eb,
        n_steps=len(sched_tile), n_valid_steps=n_valid_steps,
    )


def spherenet_layers(x, coord, edge_index, rbf_feature, angle_feature, params_list,
                     *, node_tile=128, edge_tile=256, graph=None):
    """Fused Pallas implementation of a stack of SphereNetLayer.forward calls."""
    del coord  # the PyTorch forward never uses `coord`
    x = x.astype(jnp.float32)
    N, D = x.shape
    L = len(params_list)
    if graph is None:
        graph = prepare_graph(edge_index, rbf_feature, angle_feature, N,
                              node_tile=node_tile, edge_tile=edge_tile)

    tn, te = graph["node_tile"], graph["edge_tile"]
    n_pad, e_pad, k_pad = graph["n_pad"], graph["e_pad"], graph["k_pad"]
    n_tiles, k_in = graph["n_tiles"], graph["k_in"]
    n_steps, n_valid = graph["n_steps"], graph["n_valid_steps"]

    x_p = jnp.pad(x, ((0, n_pad - N), (0, 0)))

    # Concatenate every layer's edge weights into one (k_pad, L*D) matrix, folding
    # each layer's edge bias into the row multiplying the "1"/degree column.
    we = jnp.zeros((k_pad, L * D), jnp.float32)
    for l, p in enumerate(params_list):
        w_e = p["w_e"].astype(jnp.float32)
        b_e = p["b_e"].astype(jnp.float32)
        assert w_e.shape[0] == k_in
        we = we.at[:k_in, l * D:(l + 1) * D].set(w_e)
        we = we.at[k_in, l * D:(l + 1) * D].set(b_e)
    we = we.astype(jnp.bfloat16)
    w1 = jnp.stack([p["w1"] for p in params_list]).astype(jnp.bfloat16)   # (L, D, D)
    w2 = jnp.stack([p["w2"] for p in params_list]).astype(jnp.bfloat16)   # (L, D, D)
    b1 = jnp.stack([p["b1"].reshape(1, D) for p in params_list]).astype(jnp.float32)
    b2 = jnp.stack([p["b2"].reshape(1, D) for p in params_list]).astype(jnp.float32)

    # advisory cost estimate
    flops = int(n_valid * 2 * tn * te * k_pad
                + n_tiles * (2 * tn * k_pad * L * D + L * 4 * tn * D * D))
    bytes_accessed = int(2 * n_pad * D * 4                     # x in, out
                         + e_pad * k_pad * 2 + e_pad * 4       # edge feats, rows
                         + (k_pad * L * D + 2 * L * D * D) * 2 # weights (bf16)
                         + 2 * L * D * 4)                      # biases

    def build_and_run(deep_buffering: bool):
        def stream_spec(shape, index_map):
            # deeper buffering on the big edge streams; block indices jump at
            # segment boundaries and per-block compute is short.
            if deep_buffering:
                return pl.BlockSpec(shape, index_map, pipeline_mode=pl.Buffered(3))
            return pl.BlockSpec(shape, index_map)

        grid_spec = pltpu.PrefetchScalarGridSpec(
            num_scalar_prefetch=3,
            grid=(n_steps,),
            in_specs=[
                pl.BlockSpec((tn, D), lambda t, ti, bi, fl: (ti[t], 0)),       # x
                stream_spec((te, k_pad), lambda t, ti, bi, fl: (bi[t], 0)),    # ef
                stream_spec((1, te), lambda t, ti, bi, fl: (0, bi[t])),        # rows
                pl.BlockSpec((k_pad, L * D), lambda t, ti, bi, fl: (0, 0)),    # W_e(+b_e)
                pl.BlockSpec((L, D, D), lambda t, ti, bi, fl: (0, 0, 0)),      # W1
                pl.BlockSpec((L, 1, D), lambda t, ti, bi, fl: (0, 0, 0)),      # b1
                pl.BlockSpec((L, D, D), lambda t, ti, bi, fl: (0, 0, 0)),      # W2
                pl.BlockSpec((L, 1, D), lambda t, ti, bi, fl: (0, 0, 0)),      # b2
            ],
            out_specs=pl.BlockSpec((tn, D), lambda t, ti, bi, fl: (ti[t], 0)),
            scratch_shapes=[pltpu.VMEM((tn, k_pad), jnp.float32)],
        )
        out = pl.pallas_call(
            _spherenet_stack_kernel,
            out_shape=jax.ShapeDtypeStruct((n_pad, D), jnp.float32),
            grid_spec=grid_spec,
            compiler_params=pltpu.CompilerParams(
                dimension_semantics=("arbitrary",),      # cross-step accumulation
                vmem_limit_bytes=32 * 1024 * 1024,       # safe on v5e/v6e/v7x
            ),
            cost_estimate=pl.CostEstimate(flops=flops, transcendentals=0,
                                          bytes_accessed=bytes_accessed),
        )(graph["sched_tile"], graph["sched_blk"], graph["sched_flags"],
          x_p, graph["ef"], graph["row"], we, w1, b1, w2, b2)
        return jax.block_until_ready(out)

    try:
        out = build_and_run(_supports_pipeline_mode())
    except Exception:  # fall back if Buffered(3) deep pipelining is unsupported
        out = build_and_run(False)

    return out[:N]


def _reference_layer(x, edge_index, rbf, ang, p):
    row = edge_index[0]
    edge_feat = jnp.concatenate([rbf, ang], axis=-1)
    msg = edge_feat @ p["w_e"] + p["b_e"]
    agg = jnp.zeros_like(x).at[row].add(msg)
    h = jnp.maximum(agg @ p["w1"] + p["b1"], 0.0)
    return x + h @ p["w2"] + p["b2"]


if __name__ == "__main__":
    # Small shapes consistent with the module (scaled-down dims); N/E chosen to
    # exercise node/edge padding, multiple node tiles, straddling edge blocks and
    # an empty node-tile segment (dummy schedule step / isolated nodes).
    N, E = 300, 1500                     # nodes, edges
    embed_dim, rbf_dim, angle_dim = 128, 64, 16
    num_layers = 2                       # module default is 4; kept small for the demo
    node_tile, edge_tile = 128, 256      # 3 node tiles, 6 edge blocks, ~8 grid steps

    key = jax.random.PRNGKey(0)
    ks = jax.random.split(key, 6 + 6 * num_layers)

    x = jax.random.normal(ks[0], (N, embed_dim), jnp.float32)
    coord = jax.random.normal(ks[1], (N, 3), jnp.float32)      # unused by forward
    # destinations limited to [0, 200) so the last node tile has no incoming edges
    row = jax.random.randint(ks[2], (E,), 0, 200, jnp.int32)
    col = jax.random.randint(ks[3], (E,), 0, N, jnp.int32)
    edge_index = jnp.stack([row, col])
    rbf_feature = jax.random.normal(ks[4], (E, rbf_dim), jnp.float32)
    angle_feature = jax.random.normal(ks[5], (E, angle_dim), jnp.float32)

    s = 0.05
    params = []
    for l in range(num_layers):
        kk = ks[6 + 6 * l: 6 + 6 * (l + 1)]
        params.append({
            "w_e": s * jax.random.normal(kk[0], (rbf_dim + angle_dim, embed_dim), jnp.float32),
            "b_e": s * jax.random.normal(kk[1], (embed_dim,), jnp.float32),
            "w1": s * jax.random.normal(kk[2], (embed_dim, embed_dim), jnp.float32),
            "b1": s * jax.random.normal(kk[3], (embed_dim,), jnp.float32),
            "w2": s * jax.random.normal(kk[4], (embed_dim, embed_dim), jnp.float32),
            "b2": s * jax.random.normal(kk[5], (embed_dim,), jnp.float32),
        })

    # The graph (sorted edges + flattened (tile, block) schedule) is layer-invariant:
    # build once and run the whole fused layer stack in a single pallas_call.
    graph = prepare_graph(edge_index, rbf_feature, angle_feature, N,
                          node_tile=node_tile, edge_tile=edge_tile)

    out = spherenet_layers(x, coord, edge_index, rbf_feature, angle_feature, params,
                           graph=graph)
    out = jax.block_until_ready(out)

    ref = x
    for p in params:
        ref = _reference_layer(ref, edge_index, rbf_feature, angle_feature, p)

    assert out.shape == (N, embed_dim)
    # bf16 MXU operands with f32 accumulation vs. the pure-f32 reference.
    assert jnp.allclose(out, ref, atol=5e-2, rtol=5e-2), \
        float(jnp.max(jnp.abs(out - ref)))

    print("KERNEL_OK")
</pallas_src>

<mosaic_0001>
module attributes {stable_mosaic.version = 11 : i64} {
  func.func @_spherenet_stack_kernel(%arg0: i32, %arg1: memref<8xi32, #tpu.memory_space<smem>>, %arg2: memref<8xi32, #tpu.memory_space<smem>>, %arg3: memref<8xi32, #tpu.memory_space<smem>>, %arg4: memref<128x128xf32, #tpu.memory_space<vmem>>, %arg5: memref<256x128xbf16, #tpu.memory_space<vmem>>, %arg6: memref<1x256xi32, #tpu.memory_space<vmem>>, %arg7: memref<128x256xbf16, #tpu.memory_space<vmem>>, %arg8: memref<2x128x128xbf16, #tpu.memory_space<vmem>>, %arg9: memref<2x1x128xf32, #tpu.memory_space<vmem>>, %arg10: memref<2x128x128xbf16, #tpu.memory_space<vmem>>, %arg11: memref<2x1x128xf32, #tpu.memory_space<vmem>>, %arg12: memref<128x128xf32, #tpu.memory_space<vmem>>, %arg13: memref<128x128xf32, #tpu.memory_space<vmem>>) attributes {dimension_semantics = [#tpu.dimension_semantics<arbitrary>], iteration_bounds = array<i64: 8>, scalar_prefetch = 3 : i64, scratch_operands = 1 : i64, tpu.core_type = #tpu.core_type<tc>, window_params = [{transform_indices = @transform_0, window_bounds = array<i64: 128, 128>}, {transform_indices = @transform_1, window_bounds = array<i64: 256, 128>}, {transform_indices = @transform_2, window_bounds = array<i64: 1, 256>}, {pipeline_mode = #tpu.pipeline_mode<synchronous>, transform_indices = @transform_3, window_bounds = array<i64: 128, 256>}, {pipeline_mode = #tpu.pipeline_mode<synchronous>, transform_indices = @transform_4, window_bounds = array<i64: 2, 128, 128>}, {pipeline_mode = #tpu.pipeline_mode<synchronous>, transform_indices = @transform_5, window_bounds = array<i64: 2, 1, 128>}, {pipeline_mode = #tpu.pipeline_mode<synchronous>, transform_indices = @transform_6, window_bounds = array<i64: 2, 128, 128>}, {pipeline_mode = #tpu.pipeline_mode<synchronous>, transform_indices = @transform_7, window_bounds = array<i64: 2, 1, 128>}, {transform_indices = @transform_8, window_bounds = array<i64: 128, 128>}]} {
    %0 = arith.index_cast %arg0 : i32 to index
    %1 = memref.load %arg3[%0] : memref<8xi32, #tpu.memory_space<smem>>
    %2 = arith.index_cast %arg0 : i32 to index
    %3 = memref.load %arg1[%2] : memref<8xi32, #tpu.memory_space<smem>>
    %c1_i32 = arith.constant 1 : i32
    %4 = arith.andi %1, %c1_i32 : i32
    %c0_i32 = arith.constant 0 : i32
    %5 = arith.cmpi ne, %4, %c0_i32 : i32
    %c2_i32 = arith.constant 2 : i32
    %6 = arith.andi %1, %c2_i32 : i32
    %c0_i32_0 = arith.constant 0 : i32
    %7 = arith.cmpi ne, %6, %c0_i32_0 : i32
    %c4_i32 = arith.constant 4 : i32
    %8 = arith.andi %1, %c4_i32 : i32
    %c0_i32_1 = arith.constant 0 : i32
    %9 = arith.cmpi ne, %8, %c0_i32_1 : i32
    %10 = arith.extui %5 : i1 to i32
    %c0_i32_2 = arith.constant 0 : i32
    %11 = arith.cmpi ne, %10, %c0_i32_2 : i32
    scf.if %11 {
      %cst = arith.constant 0.000000e+00 : f32
      %16 = vector.broadcast %cst : f32 to vector<128x128xf32>
      %c0 = arith.constant 0 : index
      %c0_5 = arith.constant 0 : index
      %17 = vector.load %arg13[%c0, %c0_5] : memref<128x128xf32, #tpu.memory_space<vmem>>, vector<128x128xf32>
      tpu.vector_store %arg13[%c0, %c0_5], %16 {strides = array<i32>} : memref<128x128xf32, #tpu.memory_space<vmem>>, vector<128x128xf32>,
    } else {
    }
    %12 = arith.extui %9 : i1 to i32
    %c0_i32_3 = arith.constant 0 : i32
    %13 = arith.cmpi ne, %12, %c0_i32_3 : i32
    scf.if %13 {
      %16 = tpu.iota {dimensions = array<i32: 0>} : vector<128x256xi32>
      %c128_i32 = arith.constant 128 : i32
      %17 = arith.muli %3, %c128_i32 : i32
      %18 = vector.broadcast %17 : i32 to vector<128x256xi32>
      %19 = arith.addi %16, %18 : vector<128x256xi32>
      %c0 = arith.constant 0 : index
      %c0_5 = arith.constant 0 : index
      %20 = vector.load %arg6[%c0, %c0_5] : memref<1x256xi32, #tpu.memory_space<vmem>>, vector<1x256xi32>
      %21 = vector.broadcast %20 : vector<1x256xi32> to vector<128x256xi32>
      %22 = arith.cmpi eq, %19, %21 : vector<128x256xi32>
      %23 = arith.extui %22 : vector<128x256xi1> to vector<128x256xi32>
      %24 = arith.sitofp %23 : vector<128x256xi32> to vector<128x256xf32>
      %25 = arith.truncf %24 : vector<128x256xf32> to vector<128x256xbf16>
      %c0_6 = arith.constant 0 : index
      %c0_7 = arith.constant 0 : index
      %26 = vector.load %arg13[%c0_6, %c0_7] : memref<128x128xf32, #tpu.memory_space<vmem>>, vector<128x128xf32>
      %c0_8 = arith.constant 0 : index
      %c0_9 = arith.constant 0 : index
      %27 = vector.load %arg5[%c0_8, %c0_9] : memref<256x128xbf16, #tpu.memory_space<vmem>>, vector<256x128xbf16>
      %cst = arith.constant dense<0.000000e+00> : vector<128x128xf32>
      %28 = tpu.matmul %25, %27, %cst {dimension_numbers = #tpu.dot_dimension_numbers<[1], [0], [0], [1], [0, 0, 1, 1], [], []>} : vector<128x256xbf16>, vector<256x128xbf16>, vector<128x128xf32> -> vector<128x128xf32>
      %29 = arith.addf %26, %28 : vector<128x128xf32>
      %c0_10 = arith.constant 0 : index
      %c0_11 = arith.constant 0 : index
      %30 = vector.load %arg13[%c0_10, %c0_11] : memref<128x128xf32, #tpu.memory_space<vmem>>, vector<128x128xf32>
      tpu.vector_store %arg13[%c0_10, %c0_11], %29 {strides = array<i32>} : memref<128x128xf32, #tpu.memory_space<vmem>>, vector<128x128xf32>,
    } else {
    }
    %14 = arith.extui %7 : i1 to i32
    %c0_i32_4 = arith.constant 0 : i32
    %15 = arith.cmpi ne, %14, %c0_i32_4 : i32
    scf.if %15 {
      %c0 = arith.constant 0 : index
      %c0_5 = arith.constant 0 : index
      %16 = vector.load %arg13[%c0, %c0_5] : memref<128x128xf32, #tpu.memory_space<vmem>>, vector<128x128xf32>
      %17 = arith.truncf %16 : vector<128x128xf32> to vector<128x128xbf16>
      %c0_6 = arith.constant 0 : index
      %c0_7 = arith.constant 0 : index
      %18 = vector.load %arg7[%c0_6, %c0_7] : memref<128x256xbf16, #tpu.memory_space<vmem>>, vector<128x256xbf16>
      %cst = arith.constant dense<0.000000e+00> : vector<128x256xf32>
      %19 = tpu.matmul %17, %18, %cst {dimension_numbers = #tpu.dot_dimension_numbers<[1], [0], [0], [1], [0, 0, 1, 1], [], []>} : vector<128x128xbf16>, vector<128x256xbf16>, vector<128x256xf32> -> vector<128x256xf32>
      %c0_8 = arith.constant 0 : index
      %c0_9 = arith.constant 0 : index
      %20 = vector.load %arg4[%c0_8, %c0_9] : memref<128x128xf32, #tpu.memory_space<vmem>>, vector<128x128xf32>
      %21 = vector.extract_strided_slice %19 {offsets = [0, 0], sizes = [128, 128], strides = [1, 1]} : vector<128x256xf32> to vector<128x128xf32>
      %22 = arith.truncf %21 : vector<128x128xf32> to vector<128x128xbf16>
      %c0_10 = arith.constant 0 : index
      %c0_11 = arith.constant 0 : index
      %c0_12 = arith.constant 0 : index
      %23 = vector.load %arg8[%c0_10, %c0_11, %c0_12] : memref<2x128x128xbf16, #tpu.memory_space<vmem>>, vector<1x128x128xbf16>
      %24 = vector.shape_cast %23 : vector<1x128x128xbf16> to vector<128x128xbf16>
      %cst_13 = arith.constant dense<0.000000e+00> : vector<128x128xf32>
      %25 = tpu.matmul %22, %24, %cst_13 {dimension_numbers = #tpu.dot_dimension_numbers<[1], [0], [0], [1], [0, 0, 1, 1], [], []>} : vector<128x128xbf16>, vector<128x128xbf16>, vector<128x128xf32> -> vector<128x128xf32>
      %c0_14 = arith.constant 0 : index
      %c0_15 = arith.constant 0 : index
      %c0_16 = arith.constant 0 : index
      %26 = vector.load %arg9[%c0_14, %c0_15, %c0_16] : memref<2x1x128xf32, #tpu.memory_space<vmem>>, vector<1x1x128xf32>
      %27 = vector.shape_cast %26 : vector<1x1x128xf32> to vector<1x128xf32>
      %28 = vector.broadcast %27 : vector<1x128xf32> to vector<128x128xf32>
      %29 = arith.addf %25, %28 : vector<128x128xf32>
      %cst_17 = arith.constant 0.000000e+00 : f32
      %30 = vector.broadcast %cst_17 : f32 to vector<128x128xf32>
      %31 = arith.maximumf %29, %30 : vector<128x128xf32>
      %32 = arith.truncf %31 : vector<128x128xf32> to vector<128x128xbf16>
      %c0_18 = arith.constant 0 : index
      %c0_19 = arith.constant 0 : index
      %c0_20 = arith.constant 0 : index
      %33 = vector.load %arg10[%c0_18, %c0_19, %c0_20] : memref<2x128x128xbf16, #tpu.memory_space<vmem>>, vector<1x128x128xbf16>
      %34 = vector.shape_cast %33 : vector<1x128x128xbf16> to vector<128x128xbf16>
      %cst_21 = arith.constant dense<0.000000e+00> : vector<128x128xf32>
      %35 = tpu.matmul %32, %34, %cst_21 {dimension_numbers = #tpu.dot_dimension_numbers<[1], [0], [0], [1], [0, 0, 1, 1], [], []>} : vector<128x128xbf16>, vector<128x128xbf16>, vector<128x128xf32> -> vector<128x128xf32>
      %36 = arith.addf %20, %35 : vector<128x128xf32>
      %c0_22 = arith.constant 0 : index
      %c0_23 = arith.constant 0 : index
      %c0_24 = arith.constant 0 : index
      %37 = vector.load %arg11[%c0_22, %c0_23, %c0_24] : memref<2x1x128xf32, #tpu.memory_space<vmem>>, vector<1x1x128xf32>
      %38 = vector.shape_cast %37 : vector<1x1x128xf32> to vector<1x128xf32>
      %39 = vector.broadcast %38 : vector<1x128xf32> to vector<128x128xf32>
      %40 = arith.addf %36, %39 : vector<128x128xf32>
      %41 = vector.extract_strided_slice %19 {offsets = [0, 128], sizes = [128, 128], strides = [1, 1]} : vector<128x256xf32> to vector<128x128xf32>
      %42 = arith.truncf %41 : vector<128x128xf32> to vector<128x128xbf16>
      %c1 = arith.constant 1 : index
      %c0_25 = arith.constant 0 : index
      %c0_26 = arith.constant 0 : index
      %43 = vector.load %arg8[%c1, %c0_25, %c0_26] : memref<2x128x128xbf16, #tpu.memory_space<vmem>>, vector<1x128x128xbf16>
      %44 = vector.shape_cast %43 : vector<1x128x128xbf16> to vector<128x128xbf16>
      %cst_27 = arith.constant dense<0.000000e+00> : vector<128x128xf32>
      %45 = tpu.matmul %42, %44, %cst_27 {dimension_numbers = #tpu.dot_dimension_numbers<[1], [0], [0], [1], [0, 0, 1, 1], [], []>} : vector<128x128xbf16>, vector<128x128xbf16>, vector<128x128xf32> -> vector<128x128xf32>
      %c1_28 = arith.constant 1 : index
      %c0_29 = arith.constant 0 : index
      %c0_30 = arith.constant 0 : index
      %46 = vector.load %arg9[%c1_28, %c0_29, %c0_30] : memref<2x1x128xf32, #tpu.memory_space<vmem>>, vector<1x1x128xf32>
      %47 = vector.shape_cast %46 : vector<1x1x128xf32> to vector<1x128xf32>
      %48 = vector.broadcast %47 : vector<1x128xf32> to vector<128x128xf32>
      %49 = arith.addf %45, %48 : vector<128x128xf32>
      %cst_31 = arith.constant 0.000000e+00 : f32
      %50 = vector.broadcast %cst_31 : f32 to vector<128x128xf32>
      %51 = arith.maximumf %49, %50 : vector<128x128xf32>
      %52 = arith.truncf %51 : vector<128x128xf32> to vector<128x128xbf16>
      %c1_32 = arith.constant 1 : index
      %c0_33 = arith.constant 0 : index
      %c0_34 = arith.constant 0 : index
      %53 = vector.load %arg10[%c1_32, %c0_33, %c0_34] : memref<2x128x128xbf16, #tpu.memory_space<vmem>>, vector<1x128x128xbf16>
      %54 = vector.shape_cast %53 : vector<1x128x128xbf16> to vector<128x128xbf16>
      %cst_35 = arith.constant dense<0.000000e+00> : vector<128x128xf32>
      %55 = tpu.matmul %52, %54, %cst_35 {dimension_numbers = #tpu.dot_dimension_numbers<[1], [0], [0], [1], [0, 0, 1, 1], [], []>} : vector<128x128xbf16>, vector<128x128xbf16>, vector<128x128xf32> -> vector<128x128xf32>
      %56 = arith.addf %40, %55 : vector<128x128xf32>
      %c1_36 = arith.constant 1 : index
      %c0_37 = arith.constant 0 : index
      %c0_38 = arith.constant 0 : index
      %57 = vector.load %arg11[%c1_36, %c0_37, %c0_38] : memref<2x1x128xf32, #tpu.memory_space<vmem>>, vector<1x1x128xf32>
      %58 = vector.shape_cast %57 : vector<1x1x128xf32> to vector<1x128xf32>
      %59 = vector.broadcast %58 : vector<1x128xf32> to vector<128x128xf32>
      %60 = arith.addf %56, %59 : vector<128x128xf32>
      %c0_39 = arith.constant 0 : index
      %c0_40 = arith.constant 0 : index
      %61 = vector.load %arg12[%c0_39, %c0_40] : memref<128x128xf32, #tpu.memory_space<vmem>>, vector<128x128xf32>
      tpu.vector_store %arg12[%c0_39, %c0_40], %60 {strides = array<i32>} : memref<128x128xf32, #tpu.memory_space<vmem>>, vector<128x128xf32>,
    } else {
    }
    return
  }
  func.func @transform_0(%arg0: i32, %arg1: memref<8xi32, #tpu.memory_space<smem>>, %arg2: memref<8xi32, #tpu.memory_space<smem>>, %arg3: memref<8xi32, #tpu.memory_space<smem>>) -> (i32, i32) {
    %0 = arith.index_cast %arg0 : i32 to index
    %1 = memref.load %arg1[%0] : memref<8xi32, #tpu.memory_space<smem>>
    %c0_i32 = arith.constant 0 : i32
    %c0_i32_0 = arith.constant 0 : i32
    return %1, %c0_i32 : i32, i32
  }
  func.func @transform_1(%arg0: i32, %arg1: memref<8xi32, #tpu.memory_space<smem>>, %arg2: memref<8xi32, #tpu.memory_space<smem>>, %arg3: memref<8xi32, #tpu.memory_space<smem>>) -> (i32, i32) {
    %0 = arith.index_cast %arg0 : i32 to index
    %1 = memref.load %arg2[%0] : memref<8xi32, #tpu.memory_space<smem>>
    %c0_i32 = arith.constant 0 : i32
    %c0_i32_0 = arith.constant 0 : i32
    return %1, %c0_i32 : i32, i32
  }
  func.func @transform_2(%arg0: i32, %arg1: memref<8xi32, #tpu.memory_space<smem>>, %arg2: memref<8xi32, #tpu.memory_space<smem>>, %arg3: memref<8xi32, #tpu.memory_space<smem>>) -> (i32, i32) {
    %0 = arith.index_cast %arg0 : i32 to index
    %1 = memref.load %arg2[%0] : memref<8xi32, #tpu.memory_space<smem>>
    %c0_i32 = arith.constant 0 : i32
    %c0_i32_0 = arith.constant 0 : i32
    return %c0_i32, %1 : i32, i32
  }
  func.func @transform_3(%arg0: i32, %arg1: memref<8xi32, #tpu.memory_space<smem>>, %arg2: memref<8xi32, #tpu.memory_space<smem>>, %arg3: memref<8xi32, #tpu.memory_space<smem>>) -> (i32, i32) {
    %c0_i32 = arith.constant 0 : i32
    %c0_i32_0 = arith.constant 0 : i32
    %c0_i32_1 = arith.constant 0 : i32
    return %c0_i32, %c0_i32_0 : i32, i32
  }
  func.func @transform_4(%arg0: i32, %arg1: memref<8xi32, #tpu.memory_space<smem>>, %arg2: memref<8xi32, #tpu.memory_space<smem>>, %arg3: memref<8xi32, #tpu.memory_space<smem>>) -> (i32, i32, i32) {
    %c0_i32 = arith.constant 0 : i32
    %c0_i32_0 = arith.constant 0 : i32
    %c0_i32_1 = arith.constant 0 : i32
    %c0_i32_2 = arith.constant 0 : i32
    return %c0_i32, %c0_i32_0, %c0_i32_1 : i32, i32, i32
  }
  func.func @transform_5(%arg0: i32, %arg1: memref<8xi32, #tpu.memory_space<smem>>, %arg2: memref<8xi32, #tpu.memory_space<smem>>, %arg3: memref<8xi32, #tpu.memory_space<smem>>) -> (i32, i32, i32) {
    %c0_i32 = arith.constant 0 : i32
    %c0_i32_0 = arith.constant 0 : i32
    %c0_i32_1 = arith.constant 0 : i32
    %c0_i32_2 = arith.constant 0 : i32
    return %c0_i32, %c0_i32_0, %c0_i32_1 : i32, i32, i32
  }
  func.func @transform_6(%arg0: i32, %arg1: memref<8xi32, #tpu.memory_space<smem>>, %arg2: memref<8xi32, #tpu.memory_space<smem>>, %arg3: memref<8xi32, #tpu.memory_space<smem>>) -> (i32, i32, i32) {
    %c0_i32 = arith.constant 0 : i32
    %c0_i32_0 = arith.constant 0 : i32
    %c0_i32_1 = arith.constant 0 : i32
    %c0_i32_2 = arith.constant 0 : i32
    return %c0_i32, %c0_i32_0, %c0_i32_1 : i32, i32, i32
  }
  func.func @transform_7(%arg0: i32, %arg1: memref<8xi32, #tpu.memory_space<smem>>, %arg2: memref<8xi32, #tpu.memory_space<smem>>, %arg3: memref<8xi32, #tpu.memory_space<smem>>) -> (i32, i32, i32) {
    %c0_i32 = arith.constant 0 : i32
    %c0_i32_0 = arith.constant 0 : i32
    %c0_i32_1 = arith.constant 0 : i32
    %c0_i32_2 = arith.constant 0 : i32
    return %c0_i32, %c0_i32_0, %c0_i32_1 : i32, i32, i32
  }
  func.func @transform_8(%arg0: i32, %arg1: memref<8xi32, #tpu.memory_space<smem>>, %arg2: memref<8xi32, #tpu.memory_space<smem>>, %arg3: memref<8xi32, #tpu.memory_space<smem>>) -> (i32, i32) {
    %0 = arith.index_cast %arg0 : i32 to index
    %1 = memref.load %arg1[%0] : memref<8xi32, #tpu.memory_space<smem>>
    %c0_i32 = arith.constant 0 : i32
    %c0_i32_0 = arith.constant 0 : i32
    return %1, %c0_i32 : i32, i32
  }
}

</mosaic_0001>

<bundles_post_ra>
// kernel: tpu_custom_call.1
= control target key start
LH: loop header
LB: loop body
LE: loop exit
PB: predicated region body
PF: predicated region fallthrough
CT: control target
= control target key end

     0   :  { %s2977_s23 = smov [#allocation4]   ;;  %s2978_s24 = smov [#allocation5]   ;;  %s3707_s0 = inlined_call_operand.hbm [shape: s32[8], index: 0, kind: input, shape index: {}]   ;;  %s3708_s3 = inlined_call_operand.hbm [shape: f32[384,128], index: 3, kind: input, shape index: {}]   ;;  %s3709_s4 = inlined_call_operand.hbm [shape: bf16[1536,128], index: 4, kind: input, shape index: {}]   ;;  %s3710_s5 = inlined_call_operand.hbm [shape: s32[1,1536], index: 5, kind: input, shape index: {}]   ;;  %s3711_s6 = inlined_call_operand.hbm [shape: bf16[128,256], index: 6, kind: input, shape index: {}]   ;;  %s3712_s7 = inlined_call_operand.hbm [shape: bf16[2,128,128], index: 7, kind: input, shape index: {}]   ;;  %s3713_s8 = inlined_call_operand.vmem [shape: f32[2,1,128], index: 8, kind: input, shape index: {}]   ;;  %s3714_s9 = inlined_call_operand.hbm [shape: bf16[2,128,128], index: 9, kind: input, shape index: {}]   ;;  %s3715_s10 = inlined_call_operand.vmem [shape: f32[2,1,128], index: 10, kind: input, shape index: {}]   ;;  %s3716_s11 = inlined_call_operand.hbm [shape: f32[384,128], index: 11, kind: output, shape index: {}]   ;;  %s3717_s1 = inlined_call_operand.hbm [shape: s32[8], index: 1, kind: input, shape index: {}]   ;;  %s3718_s2 = inlined_call_operand.hbm [shape: s32[8], index: 2, kind: input, shape index: {}]  }
   0x1   :  { %3741 = sst [smem:[#allocation44_spill]] %s3708_s3  ;;  %s17_s19 = sshll.u32 %s3707_s0, 4  ;;  %s18_s19 = int_to_ptr.hbm [resolvable:$true] %s17_s19 }
   0x2   :  { %3742 = sst [smem:[#allocation45_spill]] %s3709_s4  ;;  %s22_s22 = sshll.u32 %s3717_s1, 4  ;;  %s23_s22 = int_to_ptr.hbm [resolvable:$true] %s22_s22 }
   0x3   :  { %3743 = sst [smem:[#allocation46_spill]] %s3710_s5  ;;  %s27_s27 = sshll.u32 %s3718_s2, 4  ;;  %s28_s27 = int_to_ptr.hbm [resolvable:$true] %s27_s27 }
   0x4   :  { %3744 = sst [smem:[#allocation47_spill]] %s3711_s6  ;;  %s2979_s28 = smov [#allocation6]  }
   0x5   :  { %3745 = sst [smem:[#allocation48_spill]] %s3712_s7 }
   0x6   :  { %3746 = sst [smem:[#allocation49_spill]] %s3713_s8 }
   0x7   :  { %3747 = sst [smem:[#allocation50_spill]] %s3714_s9 }
   0x8   :  { %3748 = sst [smem:[#allocation51_spill]] %s3715_s10 }
   0x9   :  { %3749 = sst [smem:[#allocation52_spill]] %s3716_s11 }
   0xa   :  { %20 = dma.hbm_to_smem %s18_s19, 16, %s2977_s23, [#allocation3] }
   0xb   :  { %25 = dma.hbm_to_smem %s23_s22, 16, %s2978_s24, [#allocation3] }
   0xc   :  { %30 = dma.hbm_to_smem %s28_s27, 16, %s2979_s28, [#allocation3] }
   0xd   :  { %2899 = dma.done.wait [#allocation3], 48 }
   0xe   :  { %2900 = vsyncadd [#allocation3], 4294967248 }
   0xf   :  { %33 = sfence }
  0x10   :  { %34 = vsyncpa [#allocation8], 0 }
  0x11   :  { %36 = vsyncpa [#allocation8 + $0x1], 0 }
  0x12   :  { %37 = vsyncpa [#allocation11], 0 }
  0x13   :  { %39 = vsyncpa [#allocation11 + $0x1], 0 }
  0x14   :  { %40 = vsyncpa [#allocation14], 0 }
  0x15   :  { %41 = vsyncpa [#allocation17], 0 }
  0x16   :  { %42 = vsyncpa [#allocation9], 0 }
  0x17   :  { %44 = vsyncpa [#allocation9 + $0x1], 0  ;;  %s3060_s0 = smov 0   ;;  %s3062_s1 = smov 0  }
  0x18   :  { %s3064_s29 = smov 0   ;;  %s3066_s2 = smov 0  }
  0x19   :  { %s3068_s30 = smov 0   ;;  %s3070_s12 = smov 0  }
  0x1a   :  { %s3072_s13 = smov 0   ;;  %s3074_s14 = smov 0  }
  0x1b   :  { %s3076_s15 = smov 0   ;;  %s3078_s16 = smov 0  }
  0x1c   :  { %s3080_s17 = smov 0   ;;  %s3082_s18 = smov 0  }
  0x1d   :  { %s3084_s19 = smov 0  }
  0x1e LB: > { %3750 = sst [smem:[#allocation33_spill]] %s2927_s0  ;;  %s3126_s20 = sadd.s32 4294967295, %s2975_s19   ;;  %s2975_s19 = sphi %s3084_s19, %s3827_s19   ;;  %s2971_s18 = sphi %s3082_s18, %s3826_s18   ;;  %s2967_s17 = sphi %s3080_s17, %s3825_s17   ;;  %s2963_s16 = sphi %s3078_s16, %s3824_s16   ;;  %s2959_s15 = sphi %s3076_s15, %s3818_s15   ;;  %s2955_s14 = sphi %s3074_s14, %s3817_s14   ;;  %s2951_s13 = sphi %s3072_s13, %s3816_s13   ;;  %s2947_s12 = sphi %s3070_s12, %s3823_s12   ;;  %s2943_s30 = sphi %s3068_s30, %s3822_s30   ;;  %s2939_s2 = sphi %s3066_s2, %s3821_s2   ;;  %s2935_s29 = sphi %s3064_s29, %s3820_s29   ;;  %s2931_s1 = sphi %s3062_s1, %s3819_s1   ;;  %s2927_s0 = sphi %s3060_s0, %s3814_s0  }
  0x1f   : > { %3751 = sst [smem:[#allocation34_spill]] %s2931_s1  ;;  %s1963_s21 = sadd.s32 4294967294, %s2975_s19  }
  0x20   : > { %3752 = sst [smem:[#allocation35_spill]] %s2955_s14  ;;  %p3739_p0 = scmp.eq.s32.totalorder %s3126_s20, 0 }
  0x21   : > { %3753 = sst [smem:[#allocation36_spill]] %s2959_s15  ;;  %p258_p1 = scmp.ne.s32.totalorder %s2935_s29, %s2931_s1 }
  0x22   : > { %p259_p2 = scmp.eq.s32.totalorder %s3126_s20, 7  ;;  %p264_p3 = scmp.ne.s32.totalorder %s2931_s1, %s2927_s0 }
  0x23   : > { %p265_p4 = scmp.eq.s32.totalorder %s1963_s21, 7  ;;  %p1964_p6 = scmp.ge.s32.totalorder %s2975_s19, 1 }
  0x24   : > { %p3136_p5 = por %p259_p2, %p258_p1  ;;  %p272_p8 = scmp.lt.s32.totalorder %s2975_s19, 9 }
  0x25   : > { %p3141_p7 = por %p265_p4, %p264_p3  ;;  %s3758_s6 = sld [smem:[#allocation47_spill]] }
  0x26   : > { %s3754_s23 = scalar_select %p3136_p5, 1, 0 }
  0x27   : > { %s3756_s24 = scalar_select %p3141_p7, 1, 0 }
  0x28   : > { %3755 = sst [smem:[#allocation37_spill]] %s3754_s23  ;;  %p3149_p9 = pnand %p1964_p6, %p272_p8 }
  0x29   : > { %3757 = sst [smem:[#allocation38_spill]] %s3756_s24  ;;  %s2980_s21 = smov [#allocation13]  }
  0x2a   : > { %s3759_s28 = scalar_select %p3149_p9, 1, 0 }
  0x2b   : > { %s283_s27 = sshll.u32 %s3758_s6, 4  ;;  %p2443_p10 = pneg %p3149_p9  ;;  %s284_s27 = int_to_ptr.hbm [resolvable:$true] %s283_s27 }
  0x2c   : > { %3760 = sst [smem:[#allocation39_spill]] %s3759_s28  ;;  %s285_s22 = sshll.u32 %s2980_s21, 4  ;;  %s286_s22 = int_to_ptr.vmem [resolvable:$true] %s285_s22 }
  0x2d   : > { %p3157_p11 = pnand %p2443_p10, %p3739_p0  ;;  %s3725_s26 = smov 128  }
  0x2e   : > { %s3726_s6 = smov 8   ;;  %s3167_s24 = sadd.s32 1, %s2975_s19  }
  0x2f   : > { %2446 = dma.hbm_to_vmem [thread:$0]  (!%p3157_p11), %s284_s27, 2048, %s286_s22, [#allocation14], %s3725_s26, %s3725_s26, %s3726_s6  }
  0x30   : > { %p3738_p12 = scmp.eq.s32.totalorder %s2975_s19, 0  ;;  %s82_s21 = sld [smem:[#allocation5 + %s2975_s19]] }
  0x31   : > { %s83_s0 = sld [smem:[#allocation5 + %s3167_s24]]  ;;  %s87_s11 = sadd.s32 1, %s2959_s15 }
  0x32   : > { %p94_p13 = scmp.ne.s32.totalorder %s2959_s15, %s2955_s14  ;;  %p100_p1 = scmp.ne.s32.totalorder %s2955_s14, %s2951_s13 }
  0x33   : > { %s243_s23 = sld [smem:[#allocation4 + %s2975_s19]]  ;;  %p3737_p4 = scmp.lt.s32.totalorder %s2975_s19, 8 }
  0x34   : > { %p3180_p2 = por %p94_p13, %p3738_p12  ;;  %p3186_p3 = por %p100_p1, %p3739_p0 }
  0x35   : > { %s244_s27 = sld [smem:[#allocation4 + %s3167_s24]]  ;;  %s358_s6 = sand.u32 1, %s2959_s15  }
  0x36   : > { %s3763_s22 = scalar_select %p3186_p3, 1, 0 }
  0x37   : > { %s84_s26 = ssub.s32 %s82_s21, %s83_s0  ;;  %s1972_s8 = sshll.u32 %s358_s6, 7 }
  0x38   : > { %3764 = sst [smem:[#allocation40_spill]] %s3763_s22  ;;  %p85_p6 = scmp.eq.s32.totalorder %s84_s26, 0 }
  0x39   : > { %p3198_p8 = pnand %p3737_p4, %p3180_p2  ;;  %s360_s28 = scalar_lea.vmem [#allocation10], %s1972_s8 }
  0x3a   : > { %s3203_s14 = scalar_select %p85_p6, %s2959_s15, %s87_s11  }
  0x3b   : > { %s245_s22 = ssub.s32 %s243_s23, %s244_s27  ;;  %s3205_s5 = sshll.u32 %s360_s28, 4 }
  0x3c   : > { %3766 = sst [smem:[#allocation41_spill]] %s3203_s14  ;;  %p246_p10 = scmp.eq.s32.totalorder %s245_s22, 0 }
  0x3d   : > { %3767 = sst [smem:[#allocation42_spill]] %s3205_s5  ;;  %s3768_s0 = sadd.s32 1, %s2935_s29 }
  0x3e   : > { %s2424_s13 = scalar_select %p3180_p2, [#allocation5], [#allocation20] }
  0x3f   : > { %s3212_s26 = scalar_select %p246_p10, %s2935_s29, %s3768_s0  }
  0x40   : > { %s2425_s6 = scalar_select %p3180_p2, %s2975_s19, 0 }
  0x41   : > { %3769 = sst [smem:[#allocation43_spill]] %s3212_s26  ;;  %s3829_s13 = smov (!%p3737_p4, %s2424_s13), [#allocation24] }
  0x42   : > { %s3831_s6 = smov (!%p3737_p4, %s2425_s6), 0  ;;  %s3770_s7 = sld [smem:[#allocation48_spill]] }
  0x43   : > { %s361_s11 = sld [smem:[%s3829_s13 + %s3831_s6]]  ;;  %s2983_s28 = smov [#allocation15]  }
  0x44   : > { %s299_s22 = sshll.u32 %s2983_s28, 4  ;;  %s3771_s9 = sld [smem:[#allocation50_spill]]  ;;  %s300_s22 = int_to_ptr.vmem [resolvable:$true] %s299_s22 }
  0x45   : > { %s2984_s10 = smov 64   ;;  %s2985_s15 = smov 4  }
  0x46   : > { %s2986_s6 = smov [#allocation16]   ;;  %s3772_s4 = sld [smem:[#allocation45_spill]] }
  0x47   : > { %s316_s23 = sshll.u32 %s2986_s6, 4  ;;  %s3773_s14 = sand.u32 1, %s2975_s19   ;;  %s317_s23 = int_to_ptr.vmem [resolvable:$true] %s316_s23 }
  0x48   : > { %s297_s8 = sshll.u32 %s3770_s7, 4  ;;  %s3237_s27 = scalar_lea.sflag [#allocation11], %s3773_s14  ;;  %s298_s8 = int_to_ptr.hbm [resolvable:$true] %s297_s8 }
  0x49   : > { %2449 = dma.hbm_to_vmem [thread:$0]  (!%p3157_p11), %s298_s8, 2048, %s300_s22, [#allocation14], %s2984_s10, %s2984_s10, %s2985_s15  }
  0x4a   : > { %s314_s0 = sshll.u32 %s3771_s9, 4  ;;  %s2317_s13 = sshll.u32 %s361_s11, 7  ;;  %s3228_s0 = int_to_ptr.hbm [resolvable:$true] %s314_s0 }
  0x4b   : > { %p2703_p1 = pneg %p3198_p8 }
  0x4c   : > { %s366_s7 = scalar_lea.hbm %s3772_s4, %s2317_s13  ;;  %s2706_s22 = scalar_lea.hbm %s3772_s4, 768 }
  0x4d   : > { %s367_s28 = sshll.u32 %s366_s7, 4  ;;  %s368_s28 = int_to_ptr.hbm [resolvable:$true] %s367_s28 }
  0x4e   : > { %s2699_s9 = sshra.s32 %s368_s28, 4  ;;  %s2700_s9 = int_to_ptr.hbm [resolvable:$true] %s2699_s9 }
  0x4f   : > { %s2701_s26 = scalar_lea.hbm %s2700_s9, 128  ;;  %p2707_p10 = scmp.lt.s32.totalorder %s2700_s9, %s3772_s4 }
  0x50   : > { %p2702_p13 = scmp.ne.s32.totalorder %s2700_s9, %s2701_s26  ;;  %p2708_p4 = scmp.lt.s32.totalorder %s2706_s22, %s2701_s26 }
  0x52   : > { %p2704_p2 = pnand %p2703_p1, %p2702_p13  ;;  %p2709_p12 = por %p2708_p4, %p2707_p10 }
  0x54   : > { %p2705_p6 = pneg %p2704_p2 }
  0x56   : > { %p2710_p0 = pnand %p2709_p12, %p2705_p6 }
  0x58   : > { %2713 = shalt.err (!%p2710_p0)
}
  0x59   : > { %s3774_s7 = sld [smem:[#allocation42_spill]]  ;;  %p66_p0 = scmp.ne.s32.totalorder %s2971_s18, %s2967_s17 }
  0x5a   : > { %2452 = dma.hbm_to_vmem [thread:$0]  (!%p3157_p11), %s3228_s0, 2048, %s317_s23, [#allocation17], %s2984_s10, %s2984_s10, %s2985_s15  }
  0x5b   : > { %s54_s9 = sld [smem:[#allocation4 + %s2975_s19]]  ;;  %p72_p12 = scmp.ne.s32.totalorder %s2967_s17, %s2963_s16 }
  0x5c   : > { %s55_s1 = sld [smem:[#allocation4 + %s3167_s24]]  ;;  %s333_s26 = sand.u32 1, %s2971_s18  }
  0x5d   : > { %s59_s21 = sadd.s32 1, %s2971_s18  ;;  %p3776_p4 = scmp.eq.s32.totalorder %s3126_s20, 0 }
  0x5e   : > { %p3779_p1 = scmp.lt.s32.totalorder %s2975_s19, 8  ;;  %s3290_s22 = sld [smem:[#allocation5 + %s2975_s19]] }
  0x5f   : > { %s3775_s6 = int_to_ptr.vmem [resolvable:$true] %s3774_s7  ;;  %p3265_p13 = por %p3776_p4, %p72_p12 }
  0x60   : > { %2463 = dma.hbm_to_vmem [thread:$0]  (!%p3198_p8), %s368_s28, 2048, %s3775_s6, %s3237_s27, %s2984_s10, %s2984_s10, %s2985_s15  }
  0x61   : > { %p3778_p8 = scmp.eq.s32.totalorder %s2975_s19, 0  ;;  %s1969_s15 = sshll.u32 %s333_s26, 7 }
  0x62   : > { %s56_s25 = ssub.s32 %s54_s9, %s55_s1  ;;  %s337_s0 = scalar_lea.vmem [#allocation7], %s1969_s15 }
  0x63   : > { %p68_p11 = por %p3778_p8, %p66_p0  ;;  %p57_p6 = scmp.eq.s32.totalorder %s56_s25, 0 }
  0x64   : > { %s3279_s10 = sshll.u32 %s337_s0, 4  ;;  %p3781_p10 = pmov %p3779_p1  ;;  %s347_s10 = int_to_ptr.vmem [resolvable:$true] %s3279_s10 }
  0x65   : > { %p3275_p2 = pnand %p3779_p1, %p68_p11  ;;  %p3782_p0 = pmov %p3779_p1 }
  0x66   : > { %s2421_s23 = scalar_select %p68_p11, [#allocation4], [#allocation19] }
  0x67   : > { %s3282_s28 = scalar_select %p57_p6, %s2971_s18, %s59_s21  }
  0x68   : > { %s2422_s11 = scalar_select %p68_p11, %s2975_s19, 0 }
  0x69   : > { %s3833_s23 = smov (!%p3781_p10, %s2421_s23), [#allocation23]  ;;  %s3293_s5 = sld [smem:[#allocation5 + %s3167_s24]] }
  0x6a   : > { %s3835_s11 = smov (!%p3782_p0, %s2422_s11), 0  ;;  %p122_p12 = scmp.ne.s32.totalorder %s2947_s12, %s2943_s30 }
  0x6b   : > { %s338_s8 = sld [smem:[%s3833_s23 + %s3835_s11]]  ;;  %p128_p4 = scmp.ne.s32.totalorder %s2943_s30, %s2939_s2 }
  0x6c   : > { %s115_s13 = sadd.s32 1, %s2947_s12  ;;  %s381_s6 = sand.u32 1, %s2947_s12  }
  0x6d   : > { %s3783_s3 = sld [smem:[#allocation44_spill]]  ;;  %p3784_p8 = scmp.eq.s32.totalorder %s3126_s20, 0 }
  0x6e   : > { %p3786_p1 = scmp.eq.s32.totalorder %s2975_s19, 0  ;;  %s334_s23 = scalar_lea.sflag [#allocation8], %s333_s26 }
  0x6f   : > { %p3307_p11 = por %p128_p4, %p3784_p8  ;;  %s112_s2 = ssub.s32 %s3290_s22, %s3293_s5 }
  0x70   : > { %p3313_p6 = por %p122_p12, %p3786_p1  ;;  %p2763_p0 = pneg %p3275_p2 }
  0x71   : > { %s2316_s7 = sshll.u32 %s338_s8, 7 }
  0x73   : > { %s343_s21 = scalar_lea.hbm %s3783_s3, %s2316_s7  ;;  %s2766_s1 = scalar_lea.hbm %s3783_s3, 384 }
  0x74   : > { %s344_s25 = sshll.u32 %s343_s21, 4  ;;  %s345_s25 = int_to_ptr.hbm [resolvable:$true] %s344_s25 }
  0x75   : > { %s2759_s11 = sshra.s32 %s345_s25, 4  ;;  %s2760_s11 = int_to_ptr.hbm [resolvable:$true] %s2759_s11 }
  0x76   : > { %s2761_s8 = scalar_lea.hbm %s2760_s11, 128  ;;  %p2767_p12 = scmp.lt.s32.totalorder %s2760_s11, %s3783_s3 }
  0x77   : > { %p2762_p10 = scmp.ne.s32.totalorder %s2760_s11, %s2761_s8  ;;  %p2768_p1 = scmp.lt.s32.totalorder %s2766_s1, %s2761_s8 }
  0x79   : > { %p2764_p4 = pnand %p2763_p0, %p2762_p10  ;;  %p2769_p7 = por %p2768_p1, %p2767_p12 }
  0x7b   : > { %p2765_p8 = pneg %p2764_p4 }
  0x7d   : > { %p2770_p5 = pnand %p2769_p7, %p2765_p8 }
  0x7f   : > { %2773 = shalt.err (!%p2770_p5)
}
  0x80   : > { %s3788_s26 = smov 8   ;;  %s3789_s22 = smov 128  }
  0x81   : > { %2458 = dma.hbm_to_vmem [thread:$0]  (!%p3275_p2), %s345_s25, 2048, %s347_s10, %s334_s23, %s3789_s22, %s3789_s22, %s3788_s26  }
  0x82   : > { %p113_p10 = scmp.eq.s32.totalorder %s112_s2, 0  ;;  %s1975_s4 = sshll.u32 %s381_s6, 1 }
  0x83   : > { %s2427_s5 = scalar_select %p3313_p6, [#allocation5], [#allocation21] }
  0x84   : > { %s3337_s11 = scalar_select %p113_p10, %s2947_s12, %s115_s13  }
  0x85   : > { %s2428_s16 = scalar_select %p3313_p6, %s2975_s19, 0 }
  0x86   : > { %p3790_p5 = scmp.lt.s32.totalorder %s2975_s19, 8  ;;  %s383_s25 = scalar_lea.vmem [#allocation12], %s1975_s4 }
  0x87   : > { %s392_s6 = sshll.u32 %s383_s25, 4  ;;  %s3794_s7 = sld [smem:[#allocation46_spill]]  ;;  %s393_s6 = int_to_ptr.vmem [resolvable:$true] %s392_s6 }
  0x88   : > { %s3837_s5 = smov (!%p3790_p5, %s2427_s5), [#allocation25]  ;;  %p3791_p7 = pmov %p3790_p5 }
  0x89   : > { %p3792_p0 = pmov %p3790_p5 }
  0x8a   : > { %s3839_s16 = smov (!%p3791_p7, %s2428_s16), 0 }
  0x8b   : > { %p3350_p4 = pnand %p3792_p0, %p3313_p6  ;;  %s384_s10 = sld [smem:[%s3837_s5 + %s3839_s16]] }
  0x8d   : > { %p2793_p6 = pneg %p3350_p4  ;;  %s2796_s4 = scalar_lea.hbm %s3794_s7, 12 }
  0x91   : > { %s1976_s2 = sshll.u32 %s384_s10, 1 }
  0x92   : > { %s388_s9 = scalar_lea.hbm %s3794_s7, %s1976_s2 }
  0x93   : > { %s390_s1 = sshll.u32 %s388_s9, 4  ;;  %s391_s1 = int_to_ptr.hbm [resolvable:$true] %s390_s1 }
  0x94   : > { %s2789_s21 = sshra.s32 %s391_s1, 4  ;;  %s2790_s21 = int_to_ptr.hbm [resolvable:$true] %s2789_s21 }
  0x95   : > { %s2791_s0 = scalar_lea.hbm %s2790_s21, 2  ;;  %p2797_p1 = scmp.lt.s32.totalorder %s2790_s21, %s3794_s7 }
  0x96   : > { %p2792_p2 = scmp.ne.s32.totalorder %s2790_s21, %s2791_s0  ;;  %p2798_p10 = scmp.lt.s32.totalorder %s2796_s4, %s2791_s0 }
  0x98   : > { %p2794_p8 = pnand %p2793_p6, %p2792_p2  ;;  %p2799_p5 = por %p2798_p10, %p2797_p1 }
  0x9a   : > { %p2795_p12 = pneg %p2794_p8 }
  0x9c   : > { %p2800_p7 = pnand %p2799_p5, %p2795_p12 }
  0x9e   : > { %2803 = shalt.err (!%p2800_p7)
}
  0x9f   : > { %2468 = dma.hbm_to_vmem [thread:$0]  (!%p3350_p4), %s391_s1, 32, %s393_s6, %s3237_s27  }
  0xa0   : > { %401 = sbr.rel (%p3149_p9) target bundleno = 1068 (0x42c), region = 52  ;;  %s403_s25 = sand.u32 (!%p3149_p9), 1, %s2967_s17  }
  0xa1   : > { %s1978_s2 = sshll.u32 (!%p3149_p9), %s403_s25, 7  ;;  %s404_s23 = scalar_lea.sflag (!%p3149_p9), [#allocation8], %s403_s25 }
  0xa2   : > { %s3371_s13 = scalar_lea.vmem (!%p3149_p9), [#allocation7], %s1978_s2 }
  0xa5   : > { %2902 = dma.done.wait (%p3265_p13), %s404_s23, 2048  }
  0xa6   : > { %2904 = vsyncadd (%p3265_p13), %s404_s23, 4294965248  ;;  %s3796_s9 = sld [smem:[#allocation35_spill]]  ;;  %s413_s21 = sand.u32 1, %s3126_s20  }
  0xa7   : > { %s414_s1 = scalar_lea.sflag [#allocation11], %s413_s21 }
  0xac   : > { %s415_s27 = sand.u32 1, %s3796_s9  }
  0xad   : > { %s1979_s6 = sshll.u32 %s415_s27, 7 }
  0xae   : > { %s3379_s0 = scalar_lea.vmem [#allocation10], %s1979_s6 }
  0xaf   : > { %2906 = dma.done.wait (%p3186_p3), %s414_s1, 2048  }
  0xb0   : > { %2908 = vsyncadd (%p3186_p3), %s414_s1, 4294965248  ;;  %s425_s26 = sand.u32 1, %s2943_s30  }
  0xb1   : > { %s3386_s22 = sshll.u32 %s425_s26, 1 }
  0xb2   : > { %s427_s14 = scalar_lea.vmem [#allocation12], %s3386_s22 }
  0xb3   : > { %2910 = dma.done.wait (%p3307_p11), %s414_s1, 32  }
  0xb4   : > { %2912 = vsyncadd (%p3307_p11), %s414_s1, 4294967264  ;;  %p3798_p9 = scmp.eq.s32.totalorder %s3126_s20, 0 }
  0xb6   : > { %2914 = dma.done.wait (%p3798_p9), [#allocation14], 4096   ;;  %p3799_p13 = pmov %p3798_p9 }
  0xb7   : > { %p3800_p3 = pmov %p3798_p9 }
  0xb8   : > { %2916 = vsyncadd (%p3799_p13), [#allocation14], 4294963200 }
  0xb9   : > { %2918 = dma.done.wait (%p3800_p3), [#allocation17], 2048   ;;  %p3801_p0 = pmov %p3800_p3 }
  0xba   : > { %s3802_s4 = sld [smem:[#allocation34_spill]] }
  0xbb   : > { %2920 = vsyncadd (%p3801_p0), [#allocation17], 4294965248  ;;  %s3403_s16 = sld [smem:[#allocation6 + %s3126_s20]] }
  0xbc   : > { %s3408_s10 = sld [smem:[#allocation4 + %s3126_s20]] }
  0xc0   : > { %s483_s5 = sand.u32 1, %s3802_s4  }
  0xc1   : > { %s1984_s15 = sshll.u32 %s483_s5, 7  ;;  %s496_s25 = sand.u32 1, %s3403_s16 }
  0xc2   : > { %s498_s2 = sand.u32 2, %s3403_s16  ;;  %s500_s23 = sand.u32 4, %s3403_s16 }
  0xc3   : > { %s3413_s9 = scalar_lea.vmem [#allocation18], %s1984_s15  ;;  %p1985_p11 = scmp.eq.s32.totalorder %s496_s25, 0 }
  0xc5   : > { %504 = sbr.rel (%p1985_p11) target bundleno = 219 (0xdb), region = 80 }
  0xca   : > { %v2987_v0 = vmov 0.0  }
  0xcb   : > { %505 = vst [vmem:[#allocation2 + $0x30] sm:$0xff] %v2987_v0 }
  0xcc   : > { %506 = vst [vmem:[#allocation2] sm:$0xff] %v2987_v0 }
  0xcd   : > { %507 = vst [vmem:[#allocation2 + $0x58] sm:$0xff] %v2987_v0 }
  0xce   : > { %508 = vst [vmem:[#allocation2 + $0x18] sm:$0xff] %v2987_v0 }
  0xcf   : > { %509 = vst [vmem:[#allocation2 + $0x50] sm:$0xff] %v2987_v0 }
  0xd0   : > { %510 = vst [vmem:[#allocation2 + $0x68] sm:$0xff] %v2987_v0 }
  0xd1   : > { %511 = vst [vmem:[#allocation2 + $0x8] sm:$0xff] %v2987_v0 }
  0xd2   : > { %512 = vst [vmem:[#allocation2 + $0x48] sm:$0xff] %v2987_v0 }
  0xd3   : > { %513 = vst [vmem:[#allocation2 + $0x40] sm:$0xff] %v2987_v0 }
  0xd4   : > { %514 = vst [vmem:[#allocation2 + $0x20] sm:$0xff] %v2987_v0 }
  0xd5   : > { %515 = vst [vmem:[#allocation2 + $0x10] sm:$0xff] %v2987_v0 }
  0xd6   : > { %516 = vst [vmem:[#allocation2 + $0x38] sm:$0xff] %v2987_v0 }
  0xd7   : > { %517 = vst [vmem:[#allocation2 + $0x60] sm:$0xff] %v2987_v0 }
  0xd8   : > { %518 = vst [vmem:[#allocation2 + $0x70] sm:$0xff] %v2987_v0 }
  0xd9   : > { %519 = vst [vmem:[#allocation2 + $0x78] sm:$0xff] %v2987_v0 }
  0xda   : > { %520 = vst [vmem:[#allocation2 + $0x28] sm:$0xff] %v2987_v0 }
  0xdb PF: > { %p1986_p4 = scmp.eq.s32.totalorder %s500_s23, 0 }
  0xdc   : > { %s1987_s8 = sshll.u32 (!%p1986_p4), %s3408_s10, 7 }
  0xdd   : > { %523 = sbr.rel (%p1986_p4) target bundleno = 452 (0x1c4), region = 84 }
  0xe2   : > { %v2325_v1 = vld [vmem:[%s3379_s0 + $0x38] sm:$0xff]  ;;  %v2324_v3 = vld [vmem:[%s3379_s0 + $0x30] sm:$0xff]  ;;  %v2323_v5 = vld [vmem:[%s3379_s0 + $0x28] sm:$0xff]  ;;  %v524_v7 = vlaneseq  ;;  %v3430_v15 = vstv %s1987_s8  ;;  %v2988_v30 = vmov 1.0|1.0  }
  0xe3   : > { %v2333_v2 = vld [vmem:[%s3379_s0 + $0x78] sm:$0xff]  ;;  %818 = vmatpush.bf16.msra.mxu0 %v2325_v1  ;;  %2383 = vmatpush.bf16.msra.mxu2 %v2325_v1  ;;  %v2332_v4 = vld [vmem:[%s3379_s0 + $0x70] sm:$0xff]  ;;  %v2331_v6 = vld [vmem:[%s3379_s0 + $0x68] sm:$0xff] }
  0xe4   : > { %867 = vmatpush.bf16.msra.mxu1 %v2333_v2  ;;  %2391 = vmatpush.bf16.msra.mxu3 %v2333_v2  ;;  %v2322_v8 = vld [vmem:[%s3379_s0 + $0x20] sm:$0xff]  ;;  %v3423_v10 = vshrl.u32 %v524_v7, 7  ;;  %v2321_v11 = vld [vmem:[%s3379_s0 + $0x18] sm:$0xff]  ;;  %v2320_v14 = vld [vmem:[%s3379_s0 + $0x10] sm:$0xff] }
  0xe5   : > { %v2330_v9 = vld [vmem:[%s3379_s0 + $0x60] sm:$0xff]  ;;  %v2329_v12 = vld [vmem:[%s3379_s0 + $0x58] sm:$0xff]  ;;  %v2328_v19 = vld [vmem:[%s3379_s0 + $0x50] sm:$0xff] }
  0xe6   : > { %v526_v13 = vadd.s32 8, %v3423_v10  ;;  %v559_v16 = vld [vmem:[%s427_s14] sm:$0x3]  ;;  %v533_v17 = vadd.s32 64, %v3423_v10  ;;  %v534_v18 = vadd.s32 72, %v3423_v10  ;;  %v543_v20 = vadd.s32 %v3430_v15, %v3423_v10  ;;  %v2319_v23 = vld [vmem:[%s3379_s0 + $0x8] sm:$0xff] }
  0xe7   : > { %819 = vmatpush.bf16.msra.mxu0 %v2324_v3  ;;  %2384 = vmatpush.bf16.msra.mxu2 %v2324_v3  ;;  %v3440_v22 = vperm.slane %v559_v16, 0  ;;  %v2327_v26 = vld [vmem:[%s3379_s0 + $0x48] sm:$0xff]  ;;  %v3446_v27 = vperm.slane %v559_v16, 1  ;;  %v2318_v28 = vld [vmem:[%s3379_s0] sm:$0xff]  ;;  %v527_v31 = vadd.s32 16, %v3423_v10  ;;  %v528_v32 = vadd.s32 24, %v3423_v10 }
  0xe8   : > { %868 = vmatpush.bf16.msra.mxu1 %v2332_v4  ;;  %2392 = vmatpush.bf16.msra.mxu3 %v2332_v4  ;;  %v544_v21 = vadd.s32 %v3430_v15, %v526_v13  ;;  %v551_v24 = vadd.s32 %v3430_v15, %v533_v17  ;;  %v552_v25 = vadd.s32 %v3430_v15, %v534_v18  ;;  %v2326_v29 = vld [vmem:[%s3379_s0 + $0x40] sm:$0xff]  ;;  %v535_v33 = vadd.s32 80, %v3423_v10  ;;  %v674_v56 = vld [vmem:[#allocation2 + $0x30] sm:$0xff] }
  0xe9   : > { %vm562_vm0 = vcmp.eq.s32.totalorder %v543_v20, %v3440_v22  ;;  %vm563_vm4 = vcmp.eq.s32.totalorder %v543_v20, %v3446_v27  ;;  %v536_v34 = vadd.s32 88, %v3423_v10  ;;  %v545_v35 = vadd.s32 %v3430_v15, %v527_v31  ;;  %v682_v61 = vld [vmem:[#allocation2 + $0x40] sm:$0xff]  ;;  %v684_v17 = vld [vmem:[#allocation2 + $0x10] sm:$0xff] }
  0xea   : > { %vm564_vm1 = vcmp.eq.s32.totalorder %v544_v21, %v3440_v22  ;;  %vm578_vm2 = vcmp.eq.s32.totalorder %v551_v24, %v3440_v22  ;;  %vm580_vm3 = vcmp.eq.s32.totalorder %v552_v25, %v3440_v22  ;;  %vm565_vm5 = vcmp.eq.s32.totalorder %v544_v21, %v3446_v27  ;;  %v675_v1 = vld [vmem:[#allocation2] sm:$0xff]  ;;  %v677_v21 = vld [vmem:[#allocation2 + $0x18] sm:$0xff]  ;;  %v678_v31 = vld [vmem:[#allocation2 + $0x50] sm:$0xff] }
  0xeb   : > { %820 = vmatpush.bf16.msra.mxu0 %v2323_v5  ;;  %2385 = vmatpush.bf16.msra.mxu2 %v2323_v5  ;;  %vm2084_vm6 = vmpackc.low %vm564_vm1, %vm562_vm0  ;;  %vm579_vm7 = vcmp.eq.s32.totalorder %v551_v24, %v3446_v27  ;;  %vm581_vm8 = vcmp.eq.s32.totalorder %v552_v25, %v3446_v27  ;;  %v546_v36 = vadd.s32 %v3430_v15, %v528_v32  ;;  %v529_v39 = vadd.s32 32, %v3423_v10  ;;  %v683_v7 = vld [vmem:[#allocation2 + $0x20] sm:$0xff] }
  0xec   : > { %869 = vmatpush.bf16.msra.mxu1 %v2331_v6  ;;  %2393 = vmatpush.bf16.msra.mxu3 %v2331_v6  ;;  %vm2092_vm9 = vmpackc.low %vm580_vm3, %vm578_vm2  ;;  %v553_v37 = vadd.s32 %v3430_v15, %v535_v33  ;;  %v554_v38 = vadd.s32 %v3430_v15, %v536_v34  ;;  %vm566_vm12 = vcmp.eq.s32.totalorder %v545_v35, %v3440_v22  ;;  %v530_v40 = vadd.s32 40, %v3423_v10 }
  0xed   : > { %vm2100_vm10 = vmpackc.low %vm565_vm5, %vm563_vm4  ;;  %vm568_vm13 = vcmp.eq.s32.totalorder %v546_v36, %v3440_v22  ;;  %vm567_vm0 = vcmp.eq.s32.totalorder %v545_v35, %v3446_v27  ;;  %vm569_vm1 = vcmp.eq.s32.totalorder %v546_v36, %v3446_v27  ;;  %v537_v41 = vadd.s32 96, %v3423_v10 }
  0xee   : > { %vm2108_vm11 = vmpackc.low %vm581_vm8, %vm579_vm7  ;;  %vm582_vm14 = vcmp.eq.s32.totalorder %v553_v37, %v3440_v22  ;;  %vm584_vm15 = vcmp.eq.s32.totalorder %v554_v38, %v3440_v22  ;;  %vm583_vm3 = vcmp.eq.s32.totalorder %v553_v37, %v3446_v27  ;;  %vm585_vm4 = vcmp.eq.s32.totalorder %v554_v38, %v3446_v27  ;;  %v686_v37 = vld [vmem:[#allocation2 + $0x60] sm:$0xff] }
  0xef   : > { %821 = vmatpush.bf16.msra.mxu0 %v2322_v8  ;;  %2386 = vmatpush.bf16.msra.mxu2 %v2322_v8  ;;  %vm2086_vm2 = vmpackc.low %vm568_vm13, %vm566_vm12  ;;  %v538_v42 = vadd.s32 104, %v3423_v10  ;;  %v547_v43 = vadd.s32 %v3430_v15, %v529_v39  ;;  %v548_v44 = vadd.s32 %v3430_v15, %v530_v40  ;;  %v555_v45 = vadd.s32 %v3430_v15, %v537_v41  ;;  %v679_v41 = vld [vmem:[#allocation2 + $0x68] sm:$0xff] }
  0xf0   : > { %870 = vmatpush.bf16.msra.mxu1 %v2330_v9  ;;  %2394 = vmatpush.bf16.msra.mxu3 %v2330_v9  ;;  %vm2094_vm5 = vmpackc.low %vm584_vm15, %vm582_vm14  ;;  %v531_v47 = vadd.s32 48, %v3423_v10  ;;  %v532_v48 = vadd.s32 56, %v3423_v10  ;;  %v539_v49 = vadd.s32 112, %v3423_v10  ;;  %v540_v50 = vadd.s32 120, %v3423_v10 }
  0xf1   : > { %vm2110_vm7 = vmpackc.low %vm585_vm4, %vm583_vm3  ;;  %v556_v46 = vadd.s32 %v3430_v15, %v538_v42  ;;  %vm570_vm8 = vcmp.eq.s32.totalorder %v547_v43, %v3440_v22  ;;  %vm571_vm12 = vcmp.eq.s32.totalorder %v547_v43, %v3446_v27  ;;  %vm573_vm13 = vcmp.eq.s32.totalorder %v548_v44, %v3446_v27 }
  0xf2   : > { %vm587_vm15 = vcmp.eq.s32.totalorder %v555_v45, %v3446_v27  ;;  %v549_v51 = vadd.s32 %v3430_v15, %v531_v47  ;;  %v550_v52 = vadd.s32 %v3430_v15, %v532_v48  ;;  %v557_v53 = vadd.s32 %v3430_v15, %v539_v49  ;;  %v687_v47 = vld [vmem:[#allocation2 + $0x70] sm:$0xff] }
  0xf3   : > { %822 = vmatpush.bf16.msra.mxu0 %v2321_v11  ;;  %2387 = vmatpush.bf16.msra.mxu2 %v2321_v11  ;;  %v558_v54 = vadd.s32 %v3430_v15, %v540_v50  ;;  %v676_v11 = vld [vmem:[#allocation2 + $0x58] sm:$0xff] }
  0xf4   : > { %871 = vmatpush.bf16.msra.mxu1 %v2329_v12  ;;  %2395 = vmatpush.bf16.msra.mxu3 %v2329_v12  ;;  %vm574_vm4 = vcmp.eq.s32.totalorder %v549_v51, %v3440_v22 }
  0xf7   : > { %823 = vmatpush.bf16.msra.mxu0 %v2320_v14  ;;  %2388 = vmatpush.bf16.msra.mxu2 %v2320_v14 }
  0xf8   : > { %872 = vmatpush.bf16.msra.mxu1 %v2328_v19  ;;  %2396 = vmatpush.bf16.msra.mxu3 %v2328_v19 }
  0xfb   : > { %824 = vmatpush.bf16.msra.mxu0 %v2319_v23  ;;  %2389 = vmatpush.bf16.msra.mxu2 %v2319_v23 }
  0xfc   : > { %873 = vmatpush.bf16.msra.mxu1 %v2327_v26  ;;  %2397 = vmatpush.bf16.msra.mxu3 %v2327_v26 }
  0xff   : > { %825 = vmatpush.bf16.msra.mxu0 %v2318_v28  ;;  %2390 = vmatpush.bf16.msra.mxu2 %v2318_v28 }
 0x100   : > { %874 = vmatpush.bf16.msra.mxu1 %v2326_v29  ;;  %2398 = vmatpush.bf16.msra.mxu3 %v2326_v29 }
 0x102   : > { %2085 = vmatmul.msk.bf16.vlgmr.msra.gmra.mxu0 %vm2084_vm6, %v2988_v30  ;;  %2093 = vmatmul.msk.bf16.vlgmr.msra.gmra.mxu2 %vm2092_vm9, %v2988_v30  ;;  %vm2102_vm6 = vmpackc.low %vm569_vm1, %vm567_vm0  ;;  %vm572_vm9 = vcmp.eq.s32.totalorder %v548_v44, %v3440_v22  ;;  %vm589_vm0 = vcmp.eq.s32.totalorder %v556_v46, %v3446_v27 }
 0x103   : > { %2101 = vmatmul.msk.bf16.vlgmr.msra.gmra.mxu1 %vm2100_vm10, %v2988_v30  ;;  %2109 = vmatmul.msk.bf16.vlgmr.msra.gmra.mxu3 %vm2108_vm11, %v2988_v30  ;;  %vm586_vm10 = vcmp.eq.s32.totalorder %v555_v45, %v3440_v22  ;;  %vm588_vm11 = vcmp.eq.s32.totalorder %v556_v46, %v3440_v22  ;;  %vm2088_vm14 = vmpackc.low %vm572_vm9, %vm570_vm8  ;;  %vm575_vm8 = vcmp.eq.s32.totalorder %v549_v51, %v3446_v27  ;;  %v680_v51 = vld [vmem:[#allocation2 + $0x8] sm:$0xff] }
 0x104   : > { %vm2096_vm1 = vmpackc.low %vm588_vm11, %vm586_vm10  ;;  %vm577_vm9 = vcmp.eq.s32.totalorder %v550_v52, %v3446_v27  ;;  %vm591_vm11 = vcmp.eq.s32.totalorder %v557_v53, %v3446_v27 }
 0x105   : > { %vm2112_vm3 = vmpackc.low %vm589_vm0, %vm587_vm15 }
 0x112   : > { %2087 = vmatmul.msk.bf16.gmra.mxu0 %vm2086_vm2, %v2988_v30  ;;  %2095 = vmatmul.msk.bf16.gmra.mxu2 %vm2094_vm5, %v2988_v30  ;;  %vm2104_vm2 = vmpackc.low %vm573_vm13, %vm571_vm12  ;;  %vm576_vm5 = vcmp.eq.s32.totalorder %v550_v52, %v3440_v22  ;;  %vm593_vm12 = vcmp.eq.s32.totalorder %v558_v54, %v3446_v27  ;;  %v685_v27 = vld [vmem:[#allocation2 + $0x38] sm:$0xff] }
 0x113   : > { %2103 = vmatmul.msk.bf16.gmra.mxu1 %vm2102_vm6, %v2988_v30  ;;  %2111 = vmatmul.msk.bf16.gmra.mxu3 %vm2110_vm7, %v2988_v30  ;;  %vm590_vm6 = vcmp.eq.s32.totalorder %v557_v53, %v3440_v22  ;;  %vm592_vm7 = vcmp.eq.s32.totalorder %v558_v54, %v3440_v22  ;;  %vm2090_vm10 = vmpackc.low %vm576_vm5, %vm574_vm4 }
 0x114   : > { %vm2098_vm13 = vmpackc.low %vm592_vm7, %vm590_vm6 }
 0x115   : > { %vm2114_vm15 = vmpackc.low %vm593_vm12, %vm591_vm11 }
 0x122   : > { %2089 = vmatmul.msk.bf16.gmra.mxu0 %vm2088_vm14, %v2988_v30  ;;  %2097 = vmatmul.msk.bf16.gmra.mxu2 %vm2096_vm1, %v2988_v30  ;;  %vm2106_vm14 = vmpackc.low %vm577_vm9, %vm575_vm8 }
 0x123   : > { %2105 = vmatmul.msk.bf16.gmra.mxu1 %vm2104_vm2, %v2988_v30  ;;  %2113 = vmatmul.msk.bf16.gmra.mxu3 %vm2112_vm3, %v2988_v30 }
 0x132   : > { %2091 = vmatmul.msk.bf16.gmra.mxu0 %vm2090_vm10, %v2988_v30  ;;  %2099 = vmatmul.msk.bf16.gmra.mxu2 %vm2098_vm13, %v2988_v30 }
 0x133   : > { %2107 = vmatmul.msk.bf16.gmra.mxu1 %vm2106_vm14, %v2988_v30  ;;  %2115 = vmatmul.msk.bf16.gmra.mxu3 %vm2114_vm15, %v2988_v30 }
 0x17f   : > { %v827_v55 = vpop.f32.mrf.mxu0 }
 0x180   : > { %v876_v57 = vpop.f32.mrf.mxu1 }
 0x181   : > { %v877_v58 = vadd.f32 %v876_v57, %v827_v55  ;;  %v688_v57 = vld [vmem:[#allocation2 + $0x78] sm:$0xff] }
 0x183   : > { %v916_v59 = vadd.f32 %v877_v58, %v674_v56 }
 0x185   : > { %932 = vst [vmem:[#allocation2 + $0x30] sm:$0xff] %v916_v59  ;;  %v847_v60 = vpop.f32.mrf.mxu2 }
 0x186   : > { %v896_v62 = vpop.f32.mrf.mxu3 }
 0x187   : > { %v897_v63 = vadd.f32 %v896_v62, %v847_v60  ;;  %v829_v0 = vpop.f32.mrf.mxu0 }
 0x188   : > { %v878_v2 = vpop.f32.mrf.mxu1 }
 0x189   : > { %v924_v3 = vadd.f32 %v897_v63, %v682_v61  ;;  %v879_v4 = vadd.f32 %v878_v2, %v829_v0  ;;  %v681_v61 = vld [vmem:[#allocation2 + $0x48] sm:$0xff] }
 0x18b   : > { %940 = vst [vmem:[#allocation2 + $0x40] sm:$0xff] %v924_v3  ;;  %v917_v5 = vadd.f32 %v879_v4, %v675_v1  ;;  %v689_v3 = vld [vmem:[#allocation2 + $0x28] sm:$0xff] }
 0x18d   : > { %933 = vst [vmem:[#allocation2] sm:$0xff] %v917_v5  ;;  %v849_v6 = vpop.f32.mrf.mxu2 }
 0x18e   : > { %v898_v8 = vpop.f32.mrf.mxu3 }
 0x18f   : > { %v899_v9 = vadd.f32 %v898_v8, %v849_v6  ;;  %v832_v10 = vpop.f32.mrf.mxu0 }
 0x190   : > { %v881_v12 = vpop.f32.mrf.mxu1 }
 0x191   : > { %v925_v13 = vadd.f32 %v899_v9, %v683_v7  ;;  %v882_v14 = vadd.f32 %v881_v12, %v832_v10 }
 0x193   : > { %941 = vst [vmem:[#allocation2 + $0x20] sm:$0xff] %v925_v13  ;;  %v918_v15 = vadd.f32 %v882_v14, %v676_v11 }
 0x195   : > { %934 = vst [vmem:[#allocation2 + $0x58] sm:$0xff] %v918_v15  ;;  %v852_v16 = vpop.f32.mrf.mxu2 }
 0x196   : > { %v901_v18 = vpop.f32.mrf.mxu3 }
 0x197   : > { %v902_v19 = vadd.f32 %v901_v18, %v852_v16  ;;  %v834_v20 = vpop.f32.mrf.mxu0 }
 0x198   : > { %v883_v22 = vpop.f32.mrf.mxu1 }
 0x199   : > { %v926_v23 = vadd.f32 %v902_v19, %v684_v17  ;;  %v884_v24 = vadd.f32 %v883_v22, %v834_v20 }
 0x19b   : > { %942 = vst [vmem:[#allocation2 + $0x10] sm:$0xff] %v926_v23  ;;  %v919_v25 = vadd.f32 %v884_v24, %v677_v21 }
 0x19d   : > { %935 = vst [vmem:[#allocation2 + $0x18] sm:$0xff] %v919_v25  ;;  %v854_v26 = vpop.f32.mrf.mxu2 }
 0x19e   : > { %v903_v28 = vpop.f32.mrf.mxu3 }
 0x19f   : > { %v904_v29 = vadd.f32 %v903_v28, %v854_v26  ;;  %v837_v30 = vpop.f32.mrf.mxu0 }
 0x1a0   : > { %v886_v32 = vpop.f32.mrf.mxu1 }
 0x1a1   : > { %v927_v33 = vadd.f32 %v904_v29, %v685_v27  ;;  %v887_v34 = vadd.f32 %v886_v32, %v837_v30 }
 0x1a3   : > { %943 = vst [vmem:[#allocation2 + $0x38] sm:$0xff] %v927_v33  ;;  %v920_v35 = vadd.f32 %v887_v34, %v678_v31 }
 0x1a5   : > { %936 = vst [vmem:[#allocation2 + $0x50] sm:$0xff] %v920_v35  ;;  %v857_v36 = vpop.f32.mrf.mxu2 }
 0x1a6   : > { %v906_v38 = vpop.f32.mrf.mxu3 }
 0x1a7   : > { %v907_v39 = vadd.f32 %v906_v38, %v857_v36  ;;  %v839_v40 = vpop.f32.mrf.mxu0 }
 0x1a8   : > { %v888_v42 = vpop.f32.mrf.mxu1 }
 0x1a9   : > { %v928_v43 = vadd.f32 %v907_v39, %v686_v37  ;;  %v889_v44 = vadd.f32 %v888_v42, %v839_v40 }
 0x1ab   : > { %944 = vst [vmem:[#allocation2 + $0x60] sm:$0xff] %v928_v43  ;;  %v921_v45 = vadd.f32 %v889_v44, %v679_v41 }
 0x1ad   : > { %937 = vst [vmem:[#allocation2 + $0x68] sm:$0xff] %v921_v45  ;;  %v859_v46 = vpop.f32.mrf.mxu2 }
 0x1ae   : > { %v908_v48 = vpop.f32.mrf.mxu3 }
 0x1af   : > { %v909_v49 = vadd.f32 %v908_v48, %v859_v46  ;;  %v842_v50 = vpop.f32.mrf.mxu0 }
 0x1b0   : > { %v891_v52 = vpop.f32.mrf.mxu1 }
 0x1b1   : > { %v929_v53 = vadd.f32 %v909_v49, %v687_v47  ;;  %v892_v54 = vadd.f32 %v891_v52, %v842_v50 }
 0x1b3   : > { %945 = vst [vmem:[#allocation2 + $0x70] sm:$0xff] %v929_v53  ;;  %v922_v55 = vadd.f32 %v892_v54, %v680_v51 }
 0x1b5   : > { %938 = vst [vmem:[#allocation2 + $0x8] sm:$0xff] %v922_v55  ;;  %v862_v56 = vpop.f32.mrf.mxu2 }
 0x1b6   : > { %v911_v58 = vpop.f32.mrf.mxu3 }
 0x1b7   : > { %v912_v59 = vadd.f32 %v911_v58, %v862_v56  ;;  %v844_v60 = vpop.f32.mrf.mxu0 }
 0x1b8   : > { %v893_v62 = vpop.f32.mrf.mxu1 }
 0x1b9   : > { %v930_v63 = vadd.f32 %v912_v59, %v688_v57  ;;  %v894_v0 = vadd.f32 %v893_v62, %v844_v60 }
 0x1bb   : > { %946 = vst [vmem:[#allocation2 + $0x78] sm:$0xff] %v930_v63  ;;  %v923_v1 = vadd.f32 %v894_v0, %v681_v61 }
 0x1bd   : > { %939 = vst [vmem:[#allocation2 + $0x48] sm:$0xff] %v923_v1  ;;  %v864_v2 = vpop.f32.mrf.mxu2 }
 0x1be   : > { %v913_v4 = vpop.f32.mrf.mxu3 }
 0x1bf   : > { %v914_v5 = vadd.f32 %v913_v4, %v864_v2 }
 0x1c1   : > { %v931_v6 = vadd.f32 %v914_v5, %v689_v3 }
 0x1c3   : > { %947 = vst [vmem:[#allocation2 + $0x28] sm:$0xff] %v931_v6 }
 0x1c4 PF: > { %p2116_p2 = scmp.eq.s32.totalorder %s498_s2, 0 }
 0x1c5   : > { %s3803_s6 = sld [smem:[#allocation49_spill]] (!%p2116_p2) }
 0x1c6   : > { %950 = sbr.rel (%p2116_p2) target bundleno = 1036 (0x40c), region = 88  ;;  %s3804_s14 = sld [smem:[#allocation51_spill]] (!%p2116_p2) }
 0x1cb   : > { %v2175_v7 = vld [vmem:[#allocation13 + $0x70] sm:$0xf]  ;;  %v2349_v8 = vld [vmem:[#allocation13 + $0x74] sm:$0xf0]  ;;  %v2348_v9 = vld [vmem:[#allocation13 + $0x74] sm:$0xf] }
 0x1cc   : > { %v2176_v10 = vor.u32 %v2349_v8, %v2175_v7  ;;  %v2177_v11 = vld [vmem:[#allocation13 + $0x78] sm:$0xf0]  ;;  %v2167_v12 = vld [vmem:[#allocation13 + $0x60] sm:$0xf]  ;;  %v2347_v13 = vld [vmem:[#allocation13 + $0x64] sm:$0xf0]  ;;  %s3805_s4 = smov %s3804_s14 }
 0x1cd   : > { %v2180_v14 = vor.u32 %v2348_v9, %v2177_v11  ;;  %v2346_v15 = vld [vmem:[#allocation13 + $0x64] sm:$0xf]  ;;  %v2169_v16 = vld [vmem:[#allocation13 + $0x68] sm:$0xf0]  ;;  %v2168_v17 = vor.u32 %v2347_v13, %v2167_v12  ;;  %v2159_v19 = vld [vmem:[#allocation13 + $0x50] sm:$0xf] }
 0x1ce   : > { %1071 = vmatpush.bf16.msra.mxu0 %v2176_v10  ;;  %2399 = vmatpush.bf16.msra.mxu2 %v2176_v10  ;;  %v2172_v18 = vor.u32 %v2346_v15, %v2169_v16  ;;  %v2345_v20 = vld [vmem:[#allocation13 + $0x54] sm:$0xf0]  ;;  %v2344_v21 = vld [vmem:[#allocation13 + $0x54] sm:$0xf]  ;;  %v2161_v22 = vld [vmem:[#allocation13 + $0x58] sm:$0xf0] }
 0x1cf   : > { %1120 = vmatpush.bf16.msra.mxu1 %v2180_v14  ;;  %2407 = vmatpush.bf16.msra.mxu3 %v2180_v14  ;;  %v2160_v23 = vor.u32 %v2345_v20, %v2159_v19  ;;  %v2164_v24 = vor.u32 %v2344_v21, %v2161_v22  ;;  %v2151_v25 = vld [vmem:[#allocation13 + $0x40] sm:$0xf]  ;;  %v2343_v26 = vld [vmem:[#allocation13 + $0x44] sm:$0xf0]  ;;  %v2342_v27 = vld [vmem:[#allocation13 + $0x44] sm:$0xf] }
 0x1d0   : > { %v2153_v28 = vld [vmem:[#allocation13 + $0x48] sm:$0xf0]  ;;  %v2152_v29 = vor.u32 %v2343_v26, %v2151_v25  ;;  %v2143_v30 = vld [vmem:[#allocation13 + $0x30] sm:$0xf]  ;;  %v2341_v31 = vld [vmem:[#allocation13 + $0x34] sm:$0xf0] }
 0x1d1   : > { %v2156_v32 = vor.u32 %v2342_v27, %v2153_v28  ;;  %v2340_v33 = vld [vmem:[#allocation13 + $0x34] sm:$0xf]  ;;  %v2145_v34 = vld [vmem:[#allocation13 + $0x38] sm:$0xf0]  ;;  %v2144_v35 = vor.u32 %v2341_v31, %v2143_v30  ;;  %v2135_v37 = vld [vmem:[#allocation13 + $0x20] sm:$0xf] }
 0x1d2   : > { %1072 = vmatpush.bf16.msra.mxu0 %v2168_v17  ;;  %2400 = vmatpush.bf16.msra.mxu2 %v2168_v17  ;;  %v2148_v36 = vor.u32 %v2340_v33, %v2145_v34  ;;  %v2339_v38 = vld [vmem:[#allocation13 + $0x24] sm:$0xf0]  ;;  %v2338_v39 = vld [vmem:[#allocation13 + $0x24] sm:$0xf]  ;;  %v2137_v40 = vld [vmem:[#allocation13 + $0x28] sm:$0xf0] }
 0x1d3   : > { %1121 = vmatpush.bf16.msra.mxu1 %v2172_v18  ;;  %2408 = vmatpush.bf16.msra.mxu3 %v2172_v18  ;;  %v2136_v41 = vor.u32 %v2339_v38, %v2135_v37  ;;  %v2140_v42 = vor.u32 %v2338_v39, %v2137_v40  ;;  %v2127_v43 = vld [vmem:[#allocation13 + $0x10] sm:$0xf]  ;;  %v2337_v44 = vld [vmem:[#allocation13 + $0x14] sm:$0xf0]  ;;  %v2336_v45 = vld [vmem:[#allocation13 + $0x14] sm:$0xf] }
 0x1d4   : > { %v2129_v46 = vld [vmem:[#allocation13 + $0x18] sm:$0xf0]  ;;  %v2128_v47 = vor.u32 %v2337_v44, %v2127_v43  ;;  %v2119_v49 = vld [vmem:[#allocation13] sm:$0xf]  ;;  %v2335_v50 = vld [vmem:[#allocation13 + $0x4] sm:$0xf0] }
 0x1d5   : > { %v2132_v48 = vor.u32 %v2336_v45, %v2129_v46  ;;  %v2334_v51 = vld [vmem:[#allocation13 + $0x4] sm:$0xf]  ;;  %v2121_v52 = vld [vmem:[#allocation13 + $0x8] sm:$0xf0]  ;;  %v2120_v53 = vor.u32 %v2335_v50, %v2119_v49  ;;  %v952_v55 = vld [vmem:[#allocation2] sm:$0xff] }
 0x1d6   : > { %1073 = vmatpush.bf16.msra.mxu0 %v2160_v23  ;;  %2401 = vmatpush.bf16.msra.mxu2 %v2160_v23  ;;  %v951_v54 = vld [vmem:[#allocation2 + $0x30] sm:$0xff]  ;;  %v2124_v56 = vor.u32 %v2334_v51, %v2121_v52  ;;  %v953_v58 = vld [vmem:[#allocation2 + $0x58] sm:$0xff]  ;;  %v959_v61 = vld [vmem:[#allocation2 + $0x40] sm:$0xff] }
 0x1d7   : > { %1122 = vmatpush.bf16.msra.mxu1 %v2164_v24  ;;  %2409 = vmatpush.bf16.msra.mxu3 %v2164_v24  ;;  %v967_v57 = vpack.c.bf16 %v952_v55, %v951_v54  ;;  %v954_v59 = vld [vmem:[#allocation2 + $0x18] sm:$0xff]  ;;  %v960_v62 = vld [vmem:[#allocation2 + $0x20] sm:$0xff]  ;;  %v2355_v4 = vld [vmem:[#allocation15 + $0x28] sm:$0xff] }
 0x1d8   : > { %v968_v60 = vpack.c.bf16 %v954_v59, %v953_v58  ;;  %v971_v63 = vpack.c.bf16 %v960_v62, %v959_v61  ;;  %v2357_v0 = vld [vmem:[#allocation15 + $0x38] sm:$0xff]  ;;  %v2356_v2 = vld [vmem:[#allocation15 + $0x30] sm:$0xff]  ;;  %v956_v6 = vld [vmem:[#allocation2 + $0x68] sm:$0xff] }
 0x1d9   : > { %v2373_v1 = vld [vmem:[#allocation15 + $0x78] sm:$0xff]  ;;  %v2372_v3 = vld [vmem:[#allocation15 + $0x70] sm:$0xff]  ;;  %v2354_v10 = vld [vmem:[#allocation15 + $0x20] sm:$0xff] }
 0x1da   : > { %1074 = vmatpush.bf16.msra.mxu0 %v2152_v29  ;;  %2402 = vmatpush.bf16.msra.mxu2 %v2152_v29  ;;  %v955_v5 = vld [vmem:[#allocation2 + $0x50] sm:$0xff]  ;;  %v962_v9 = vld [vmem:[#allocation2 + $0x38] sm:$0xff]  ;;  %v2370_v15 = vld [vmem:[#allocation15 + $0x60] sm:$0xff] }
 0x1db   : > { %1123 = vmatpush.bf16.msra.mxu1 %v2156_v32  ;;  %2410 = vmatpush.bf16.msra.mxu3 %v2156_v32  ;;  %v969_v7 = vpack.c.bf16 %v956_v6, %v955_v5  ;;  %v961_v8 = vld [vmem:[#allocation2 + $0x10] sm:$0xff]  ;;  %v2353_v12 = vld [vmem:[#allocation15 + $0x18] sm:$0xff]  ;;  %v957_v16 = vld [vmem:[#allocation2 + $0x8] sm:$0xff] }
 0x1dc   : > { %v972_v11 = vpack.c.bf16 %v962_v9, %v961_v8  ;;  %v2371_v13 = vld [vmem:[#allocation15 + $0x68] sm:$0xff]  ;;  %v2352_v14 = vld [vmem:[#allocation15 + $0x10] sm:$0xff]  ;;  %v2369_v19 = vld [vmem:[#allocation15 + $0x58] sm:$0xff] }
 0x1dd   : > { %v958_v17 = vld [vmem:[#allocation2 + $0x48] sm:$0xff]  ;;  %v963_v21 = vld [vmem:[#allocation2 + $0x60] sm:$0xff]  ;;  %v964_v22 = vld [vmem:[#allocation2 + $0x70] sm:$0xff] }
 0x1de   : > { %1075 = vmatpush.bf16.msra.mxu0 %v2144_v35  ;;  %2403 = vmatpush.bf16.msra.mxu2 %v2144_v35  ;;  %v2351_v18 = vld [vmem:[#allocation15 + $0x8] sm:$0xff]  ;;  %v970_v20 = vpack.c.bf16 %v958_v17, %v957_v16  ;;  %v973_v23 = vpack.c.bf16 %v964_v22, %v963_v21  ;;  %v965_v24 = vld [vmem:[#allocation2 + $0x78] sm:$0xff]  ;;  %v2350_v28 = vld [vmem:[#allocation15] sm:$0xff] }
 0x1df   : > { %1124 = vmatpush.bf16.msra.mxu1 %v2148_v36  ;;  %2411 = vmatpush.bf16.msra.mxu3 %v2148_v36  ;;  %v966_v25 = vld [vmem:[#allocation2 + $0x28] sm:$0xff]  ;;  %v2368_v27 = vld [vmem:[#allocation15 + $0x50] sm:$0xff]  ;;  %v2365_v59 = vld [vmem:[#allocation16 + $0x38] sm:$0xff] }
 0x1e0   : > { %v974_v26 = vpack.c.bf16 %v966_v25, %v965_v24  ;;  %v2367_v29 = vld [vmem:[#allocation15 + $0x48] sm:$0xff]  ;;  %v2366_v30 = vld [vmem:[#allocation15 + $0x40] sm:$0xff]  ;;  %v2364_v61 = vld [vmem:[#allocation16 + $0x30] sm:$0xff] }
 0x1e1   : > { %v2362_v6 = vld [vmem:[#allocation16 + $0x20] sm:$0xff]  ;;  %v2376_v21 = vld [vmem:[#allocation16 + $0x50] sm:$0xff]  ;;  %v2375_v24 = vld [vmem:[#allocation16 + $0x48] sm:$0xff] }
 0x1e2   : > { %1076 = vmatpush.bf16.msra.mxu0 %v2136_v41  ;;  %2404 = vmatpush.bf16.msra.mxu2 %v2136_v41  ;;  %v2374_v25 = vld [vmem:[#allocation16 + $0x40] sm:$0xff] }
 0x1e3   : > { %1125 = vmatpush.bf16.msra.mxu1 %v2140_v42  ;;  %2412 = vmatpush.bf16.msra.mxu3 %v2140_v42 }
 0x1e6   : > { %1077 = vmatpush.bf16.msra.mxu0 %v2128_v47  ;;  %2405 = vmatpush.bf16.msra.mxu2 %v2128_v47 }
 0x1e7   : > { %1126 = vmatpush.bf16.msra.mxu1 %v2132_v48  ;;  %2413 = vmatpush.bf16.msra.mxu3 %v2132_v48 }
 0x1ea   : > { %1078 = vmatpush.bf16.msra.mxu0 %v2120_v53  ;;  %2406 = vmatpush.bf16.msra.mxu2 %v2120_v53 }
 0x1eb   : > { %1127 = vmatpush.bf16.msra.mxu1 %v2124_v56  ;;  %2414 = vmatpush.bf16.msra.mxu3 %v2124_v56 }
 0x1ed   : > { %1079 = vmatmul.bf16.vlgmr.msra.gmra.mxu0 %v967_v57  ;;  %1099 = vmatmul.bf16.vlgmr.msra.gmra.mxu2 %v971_v63 }
 0x1ee   : > { %1128 = vmatmul.bf16.vlgmr.msra.gmra.mxu1 %v967_v57  ;;  %1148 = vmatmul.bf16.vlgmr.msra.gmra.mxu3 %v971_v63 }
 0x1ef   : > { %1261 = vmatpush.bf16.msrb.mxu2 %v2357_v0  ;;  %1561 = vmatpush.bf16.msrb.mxu0 %v2373_v1 }
 0x1f0   : > { %1398 = vmatpush.bf16.msrb.mxu3 %v2365_v59 }
 0x1f3   : > { %1262 = vmatpush.bf16.msrb.mxu2 %v2356_v2  ;;  %1562 = vmatpush.bf16.msrb.mxu0 %v2372_v3  ;;  %v2363_v2 = vld [vmem:[#allocation16 + $0x28] sm:$0xff]  ;;  %v2380_v3 = vld [vmem:[#allocation16 + $0x70] sm:$0xff] }
 0x1f4   : > { %1399 = vmatpush.bf16.msrb.mxu3 %v2364_v61 }
 0x1f7   : > { %1263 = vmatpush.bf16.msrb.mxu2 %v2355_v4  ;;  %1563 = vmatpush.bf16.msrb.mxu0 %v2371_v13  ;;  %v2378_v13 = vld [vmem:[#allocation16 + $0x60] sm:$0xff] }
 0x1f8   : > { %1400 = vmatpush.bf16.msrb.mxu3 %v2363_v2 }
 0x1fb   : > { %1264 = vmatpush.bf16.msrb.mxu2 %v2354_v10  ;;  %1564 = vmatpush.bf16.msrb.mxu0 %v2370_v15  ;;  %v2377_v15 = vld [vmem:[#allocation16 + $0x58] sm:$0xff] }
 0x1fc   : > { %1401 = vmatpush.bf16.msrb.mxu3 %v2362_v6 }
 0x1fd   : > { %1084 = vmatmul.bf16.gmra.mxu0 %v968_v60  ;;  %1104 = vmatmul.bf16.gmra.mxu2 %v972_v11 }
 0x1fe   : > { %1133 = vmatmul.bf16.gmra.mxu1 %v968_v60  ;;  %1153 = vmatmul.bf16.gmra.mxu3 %v972_v11  ;;  %v2381_v60 = vld [vmem:[#allocation16 + $0x78] sm:$0xff] }
 0x1ff   : > { %1265 = vmatpush.bf16.msrb.mxu2 %v2353_v12  ;;  %1565 = vmatpush.bf16.msrb.mxu0 %v2369_v19  ;;  %v2361_v12 = vld [vmem:[#allocation16 + $0x18] sm:$0xff] }
 0x200   : > { %1699 = vmatpush.bf16.msrb.mxu1 %v2381_v60  ;;  %1402 = vmatpush.bf16.msrb.mxu3 %v2361_v12 }
 0x203   : > { %1266 = vmatpush.bf16.msrb.mxu2 %v2352_v14  ;;  %1566 = vmatpush.bf16.msrb.mxu0 %v2368_v27  ;;  %v2360_v14 = vld [vmem:[#allocation16 + $0x10] sm:$0xff] }
 0x204   : > { %1700 = vmatpush.bf16.msrb.mxu1 %v2380_v3  ;;  %1403 = vmatpush.bf16.msrb.mxu3 %v2360_v14 }
 0x207   : > { %1267 = vmatpush.bf16.msrb.mxu2 %v2351_v18  ;;  %1567 = vmatpush.bf16.msrb.mxu0 %v2367_v29 }
 0x20b   : > { %1268 = vmatpush.bf16.msrb.mxu2 %v2350_v28  ;;  %1568 = vmatpush.bf16.msrb.mxu0 %v2366_v30  ;;  %v2358_v28 = vld [vmem:[#allocation16] sm:$0xff] }
 0x20d   : > { %1089 = vmatmul.bf16.gmra.mxu0 %v969_v7  ;;  %1109 = vmatmul.bf16.gmra.mxu2 %v973_v23 }
 0x20e   : > { %1138 = vmatmul.bf16.gmra.mxu1 %v969_v7  ;;  %1158 = vmatmul.bf16.gmra.mxu3 %v973_v23  ;;  %v2379_v7 = vld [vmem:[#allocation16 + $0x68] sm:$0xff] }
 0x20f   : > { %1701 = vmatpush.bf16.msrb.mxu1 %v2379_v7  ;;  %v2359_v23 = vld [vmem:[#allocation16 + $0x8] sm:$0xff] }
 0x210   : > { %1404 = vmatpush.bf16.msrb.mxu3 %v2359_v23 }
 0x213   : > { %1702 = vmatpush.bf16.msrb.mxu1 %v2378_v13 }
 0x214   : > { %1405 = vmatpush.bf16.msrb.mxu3 %v2358_v28 }
 0x217   : > { %1703 = vmatpush.bf16.msrb.mxu1 %v2377_v15 }
 0x21b   : > { %1704 = vmatpush.bf16.msrb.mxu1 %v2376_v21 }
 0x21d   : > { %1094 = vmatmul.bf16.gmra.mxu0 %v970_v20  ;;  %1114 = vmatmul.bf16.gmra.mxu2 %v974_v26 }
 0x21e   : > { %1143 = vmatmul.bf16.gmra.mxu1 %v970_v20  ;;  %1163 = vmatmul.bf16.gmra.mxu3 %v974_v26 }
 0x21f   : > { %1705 = vmatpush.bf16.msrb.mxu1 %v2375_v24 }
 0x223   : > { %1706 = vmatpush.bf16.msrb.mxu1 %v2374_v25 }
 0x26a   : > { %v1080_v31 = vpop.f32.mrf.mxu0 }
 0x26b   : > { %v1129_v32 = vpop.f32.mrf.mxu1 }
 0x270   : > { %v1100_v51 = vpop.f32.mrf.mxu2 }
 0x271   : > { %v1149_v49 = vpop.f32.mrf.mxu3 }
 0x272   : > { %v1082_v33 = vpop.f32.mrf.mxu0 }
 0x273   : > { %v1185_v34 = vpack.c.bf16 %v1082_v33, %v1080_v31  ;;  %v1131_v35 = vpop.f32.mrf.mxu1 }
 0x274   : > { %v1483_v36 = vpack.c.bf16 %v1131_v35, %v1129_v32  ;;  %v3527_v32 = vld [vmem:[%s3803_s6 + $0x1] ss:$0 sm:$0xff]  ;;  %v3533_v35 = vld [vmem:[%s3803_s6] ss:$0 sm:$0xff] }
 0x275   : > { %1269 = vmatmul.bf16.vlgmr.msrb.gmra.mxu2 %v1185_v34 }
 0x276   : > { %1569 = vmatmul.bf16.vlgmr.msrb.gmra.mxu0 %v1483_v36 }
 0x278   : > { %v1102_v58 = vpop.f32.mrf.mxu2 }
 0x279   : > { %v1151_v56 = vpop.f32.mrf.mxu3  ;;  %v1189_v1 = vpack.c.bf16 %v1102_v58, %v1100_v51 }
 0x27a   : > { %v1085_v37 = vpop.f32.mrf.mxu0  ;;  %v1487_v0 = vpack.c.bf16 %v1151_v56, %v1149_v49 }
 0x27b   : > { %v1134_v38 = vpop.f32.mrf.mxu1 }
 0x280   : > { %v1105_v63 = vpop.f32.mrf.mxu2 }
 0x281   : > { %v1154_v62 = vpop.f32.mrf.mxu3 }
 0x282   : > { %v1087_v39 = vpop.f32.mrf.mxu0 }
 0x283   : > { %v1186_v40 = vpack.c.bf16 %v1087_v39, %v1085_v37  ;;  %v1136_v41 = vpop.f32.mrf.mxu1 }
 0x284   : > { %v1484_v42 = vpack.c.bf16 %v1136_v41, %v1134_v38 }
 0x285   : > { %1274 = vmatmul.bf16.gmra.mxu2 %v1186_v40 }
 0x286   : > { %1574 = vmatmul.bf16.gmra.mxu0 %v1484_v42 }
 0x288   : > { %v1107_v5 = vpop.f32.mrf.mxu2 }
 0x289   : > { %v1156_v4 = vpop.f32.mrf.mxu3  ;;  %v1190_v11 = vpack.c.bf16 %v1107_v5, %v1105_v63 }
 0x28a   : > { %v1090_v43 = vpop.f32.mrf.mxu0  ;;  %v1488_v10 = vpack.c.bf16 %v1156_v4, %v1154_v62 }
 0x28b   : > { %v1139_v44 = vpop.f32.mrf.mxu1 }
 0x290   : > { %v1110_v9 = vpop.f32.mrf.mxu2 }
 0x291   : > { %v1159_v8 = vpop.f32.mrf.mxu3 }
 0x292   : > { %v1092_v45 = vpop.f32.mrf.mxu0 }
 0x293   : > { %v1187_v46 = vpack.c.bf16 %v1092_v45, %v1090_v43  ;;  %v1141_v47 = vpop.f32.mrf.mxu1 }
 0x294   : > { %v1485_v48 = vpack.c.bf16 %v1141_v47, %v1139_v44 }
 0x295   : > { %1279 = vmatmul.bf16.gmra.mxu2 %v1187_v46 }
 0x296   : > { %1579 = vmatmul.bf16.gmra.mxu0 %v1485_v48 }
 0x298   : > { %v1112_v17 = vpop.f32.mrf.mxu2 }
 0x299   : > { %v1161_v16 = vpop.f32.mrf.mxu3  ;;  %v1191_v19 = vpack.c.bf16 %v1112_v17, %v1110_v9 }
 0x29a   : > { %v1095_v50 = vpop.f32.mrf.mxu0  ;;  %v1489_v18 = vpack.c.bf16 %v1161_v16, %v1159_v8 }
 0x29b   : > { %v1144_v52 = vpop.f32.mrf.mxu1 }
 0x2a0   : > { %v1115_v22 = vpop.f32.mrf.mxu2 }
 0x2a1   : > { %v1164_v20 = vpop.f32.mrf.mxu3 }
 0x2a2   : > { %v1097_v53 = vpop.f32.mrf.mxu0 }
 0x2a3   : > { %v1188_v54 = vpack.c.bf16 %v1097_v53, %v1095_v50  ;;  %v1146_v55 = vpop.f32.mrf.mxu1 }
 0x2a4   : > { %v1486_v57 = vpack.c.bf16 %v1146_v55, %v1144_v52 }
 0x2a5   : > { %1284 = vmatmul.bf16.gmra.mxu2 %v1188_v54 }
 0x2a6   : > { %1584 = vmatmul.bf16.gmra.mxu0 %v1486_v57 }
 0x2a8   : > { %v1117_v27 = vpop.f32.mrf.mxu2 }
 0x2a9   : > { %v1166_v26 = vpop.f32.mrf.mxu3  ;;  %v1192_v30 = vpack.c.bf16 %v1117_v27, %v1115_v22 }
 0x2aa   : > { %v1490_v29 = vpack.c.bf16 %v1166_v26, %v1164_v20 }
 0x2b5   : > { %1289 = vmatmul.bf16.gmra.mxu2 %v1189_v1 }
 0x2b6   : > { %1589 = vmatmul.bf16.gmra.mxu0 %v1487_v0 }
 0x2c5   : > { %1294 = vmatmul.bf16.gmra.mxu2 %v1190_v11 }
 0x2c6   : > { %1594 = vmatmul.bf16.gmra.mxu0 %v1488_v10 }
 0x2d5   : > { %1299 = vmatmul.bf16.gmra.mxu2 %v1191_v19 }
 0x2d6   : > { %1599 = vmatmul.bf16.gmra.mxu0 %v1489_v18 }
 0x2e5   : > { %1304 = vmatmul.bf16.gmra.mxu2 %v1192_v30 }
 0x2e6   : > { %1604 = vmatmul.bf16.gmra.mxu0 %v1490_v29 }
 0x2f3   : > { %v1570_v31 = vpop.f32.mrf.mxu0 }
 0x2f4   : > { %v1571_v33 = vadd.f32 %v3527_v32, %v1570_v31 }
 0x2f6   : > { %v1610_v37 = vmax.f32 %v1571_v33, 0.0 }
 0x2f8   : > { %v1270_v34 = vpop.f32.mrf.mxu2 }
 0x2f9   : > { %v1271_v40 = vadd.f32 %v3533_v35, %v1270_v34 }
 0x2fb   : > { %v1572_v36 = vpop.f32.mrf.mxu0  ;;  %v1310_v44 = vmax.f32 %v1271_v40, 0.0 }
 0x2fc   : > { %v1573_v38 = vadd.f32 %v3527_v32, %v1572_v36 }
 0x2fe   : > { %v1611_v39 = vmax.f32 %v1573_v38, 0.0 }
 0x300   : > { %v1626_v41 = vpack.c.bf16 %v1611_v39, %v1610_v37  ;;  %v1272_v42 = vpop.f32.mrf.mxu2 }
 0x301   : > { %v1273_v43 = vadd.f32 %v3533_v35, %v1272_v42 }
 0x302   : > { %1707 = vmatmul.bf16.vlgmr.msrb.gmra.mxu1 %v1626_v41 }
 0x303   : > { %v1311_v45 = vmax.f32 %v1273_v43, 0.0  ;;  %v1575_v46 = vpop.f32.mrf.mxu0 }
 0x304   : > { %v1576_v48 = vadd.f32 %v3527_v32, %v1575_v46 }
 0x305   : > { %v1326_v47 = vpack.c.bf16 %v1311_v45, %v1310_v44 }
 0x306   : > { %v1612_v51 = vmax.f32 %v1576_v48, 0.0 }
 0x307   : > { %1406 = vmatmul.bf16.vlgmr.msrb.gmra.mxu3 %v1326_v47 }
 0x308   : > { %v1275_v49 = vpop.f32.mrf.mxu2 }
 0x309   : > { %v1276_v54 = vadd.f32 %v3533_v35, %v1275_v49 }
 0x30b   : > { %v1577_v50 = vpop.f32.mrf.mxu0  ;;  %v1312_v58 = vmax.f32 %v1276_v54, 0.0 }
 0x30c   : > { %v1578_v52 = vadd.f32 %v3527_v32, %v1577_v50 }
 0x30e   : > { %v1613_v53 = vmax.f32 %v1578_v52, 0.0 }
 0x310   : > { %v1277_v55 = vpop.f32.mrf.mxu2  ;;  %v1627_v56 = vpack.c.bf16 %v1613_v53, %v1612_v51 }
 0x311   : > { %v1278_v57 = vadd.f32 %v3533_v35, %v1277_v55 }
 0x312   : > { %1712 = vmatmul.bf16.gmra.mxu1 %v1627_v56 }
 0x313   : > { %v1313_v59 = vmax.f32 %v1278_v57, 0.0  ;;  %v1580_v60 = vpop.f32.mrf.mxu0 }
 0x314   : > { %v1581_v62 = vadd.f32 %v3527_v32, %v1580_v60 }
 0x315   : > { %v1327_v61 = vpack.c.bf16 %v1313_v59, %v1312_v58 }
 0x316   : > { %v1614_v1 = vmax.f32 %v1581_v62, 0.0 }
 0x317   : > { %1411 = vmatmul.bf16.gmra.mxu3 %v1327_v61 }
 0x318   : > { %v1280_v63 = vpop.f32.mrf.mxu2 }
 0x319   : > { %v1281_v4 = vadd.f32 %v3533_v35, %v1280_v63 }
 0x31b   : > { %v1582_v0 = vpop.f32.mrf.mxu0  ;;  %v1314_v8 = vmax.f32 %v1281_v4, 0.0 }
 0x31c   : > { %v1583_v2 = vadd.f32 %v3527_v32, %v1582_v0 }
 0x31e   : > { %v1615_v3 = vmax.f32 %v1583_v2, 0.0 }
 0x320   : > { %v1282_v5 = vpop.f32.mrf.mxu2  ;;  %v1628_v6 = vpack.c.bf16 %v1615_v3, %v1614_v1 }
 0x321   : > { %v1283_v7 = vadd.f32 %v3533_v35, %v1282_v5 }
 0x322   : > { %1717 = vmatmul.bf16.gmra.mxu1 %v1628_v6 }
 0x323   : > { %v1315_v9 = vmax.f32 %v1283_v7, 0.0  ;;  %v1585_v10 = vpop.f32.mrf.mxu0 }
 0x324   : > { %v1586_v12 = vadd.f32 %v3527_v32, %v1585_v10 }
 0x325   : > { %v1328_v11 = vpack.c.bf16 %v1315_v9, %v1314_v8 }
 0x326   : > { %v1616_v15 = vmax.f32 %v1586_v12, 0.0 }
 0x327   : > { %1416 = vmatmul.bf16.gmra.mxu3 %v1328_v11 }
 0x328   : > { %v1285_v13 = vpop.f32.mrf.mxu2 }
 0x329   : > { %v1286_v18 = vadd.f32 %v3533_v35, %v1285_v13 }
 0x32b   : > { %v1587_v14 = vpop.f32.mrf.mxu0  ;;  %v1316_v22 = vmax.f32 %v1286_v18, 0.0 }
 0x32c   : > { %v1588_v16 = vadd.f32 %v3527_v32, %v1587_v14 }
 0x32e   : > { %v1617_v17 = vmax.f32 %v1588_v16, 0.0 }
 0x330   : > { %v1287_v19 = vpop.f32.mrf.mxu2  ;;  %v1629_v20 = vpack.c.bf16 %v1617_v17, %v1616_v15 }
 0x331   : > { %v1288_v21 = vadd.f32 %v3533_v35, %v1287_v19 }
 0x332   : > { %1722 = vmatmul.bf16.gmra.mxu1 %v1629_v20 }
 0x333   : > { %v1317_v23 = vmax.f32 %v1288_v21, 0.0  ;;  %v1590_v24 = vpop.f32.mrf.mxu0  ;;  %v1169_v21 = vld [vmem:[%s3371_s13] sm:$0xff] }
 0x334   : > { %v1591_v26 = vadd.f32 %v3527_v32, %v1590_v24  ;;  %v3576_v24 = vld [vmem:[%s3805_s4 + $0x1] ss:$0 sm:$0xff] }
 0x335   : > { %v1329_v25 = vpack.c.bf16 %v1317_v23, %v1316_v22 }
 0x336   : > { %v1618_v29 = vmax.f32 %v1591_v26, 0.0 }
 0x337   : > { %1421 = vmatmul.bf16.gmra.mxu3 %v1329_v25 }
 0x338   : > { %v1290_v27 = vpop.f32.mrf.mxu2 }
 0x339   : > { %v1291_v33 = vadd.f32 %v3533_v35, %v1290_v27  ;;  %v1170_v27 = vld [vmem:[%s3371_s13 + $0x8] sm:$0xff] }
 0x33b   : > { %v1592_v28 = vpop.f32.mrf.mxu0  ;;  %v1318_v38 = vmax.f32 %v1291_v33, 0.0 }
 0x33c   : > { %v1593_v30 = vadd.f32 %v3527_v32, %v1592_v28 }
 0x33e   : > { %v1619_v31 = vmax.f32 %v1593_v30, 0.0 }
 0x340   : > { %v1292_v34 = vpop.f32.mrf.mxu2  ;;  %v1630_v36 = vpack.c.bf16 %v1619_v31, %v1618_v29 }
 0x341   : > { %v1293_v37 = vadd.f32 %v3533_v35, %v1292_v34 }
 0x342   : > { %1727 = vmatmul.bf16.gmra.mxu1 %v1630_v36  ;;  %v1171_v36 = vld [vmem:[%s3371_s13 + $0x10] sm:$0xff] }
 0x343   : > { %v1319_v39 = vmax.f32 %v1293_v37, 0.0  ;;  %v1595_v40 = vpop.f32.mrf.mxu0 }
 0x344   : > { %v1596_v42 = vadd.f32 %v3527_v32, %v1595_v40 }
 0x345   : > { %v1330_v41 = vpack.c.bf16 %v1319_v39, %v1318_v38 }
 0x346   : > { %v1620_v45 = vmax.f32 %v1596_v42, 0.0 }
 0x347   : > { %1426 = vmatmul.bf16.gmra.mxu3 %v1330_v41 }
 0x348   : > { %v1295_v43 = vpop.f32.mrf.mxu2 }
 0x349   : > { %v1296_v48 = vadd.f32 %v3533_v35, %v1295_v43  ;;  %v1172_v43 = vld [vmem:[%s3371_s13 + $0x18] sm:$0xff] }
 0x34b   : > { %v1597_v44 = vpop.f32.mrf.mxu0  ;;  %v1320_v52 = vmax.f32 %v1296_v48, 0.0 }
 0x34c   : > { %v1598_v46 = vadd.f32 %v3527_v32, %v1597_v44 }
 0x34e   : > { %v1621_v47 = vmax.f32 %v1598_v46, 0.0 }
 0x350   : > { %v1297_v49 = vpop.f32.mrf.mxu2  ;;  %v1631_v50 = vpack.c.bf16 %v1621_v47, %v1620_v45 }
 0x351   : > { %v1298_v51 = vadd.f32 %v3533_v35, %v1297_v49 }
 0x352   : > { %1732 = vmatmul.bf16.gmra.mxu1 %v1631_v50  ;;  %v1173_v50 = vld [vmem:[%s3371_s13 + $0x20] sm:$0xff] }
 0x353   : > { %v1321_v53 = vmax.f32 %v1298_v51, 0.0  ;;  %v1600_v54 = vpop.f32.mrf.mxu0 }
 0x354   : > { %v1601_v56 = vadd.f32 %v3527_v32, %v1600_v54 }
 0x355   : > { %v1331_v55 = vpack.c.bf16 %v1321_v53, %v1320_v52 }
 0x356   : > { %v1622_v59 = vmax.f32 %v1601_v56, 0.0 }
 0x357   : > { %1431 = vmatmul.bf16.gmra.mxu3 %v1331_v55 }
 0x358   : > { %v1300_v57 = vpop.f32.mrf.mxu2 }
 0x359   : > { %v1301_v62 = vadd.f32 %v3533_v35, %v1300_v57  ;;  %v1174_v57 = vld [vmem:[%s3371_s13 + $0x28] sm:$0xff] }
 0x35b   : > { %v1602_v58 = vpop.f32.mrf.mxu0  ;;  %v1322_v2 = vmax.f32 %v1301_v62, 0.0 }
 0x35c   : > { %v1603_v60 = vadd.f32 %v3527_v32, %v1602_v58 }
 0x35e   : > { %v1623_v61 = vmax.f32 %v1603_v60, 0.0 }
 0x360   : > { %v1302_v63 = vpop.f32.mrf.mxu2  ;;  %v1632_v0 = vpack.c.bf16 %v1623_v61, %v1622_v59 }
 0x361   : > { %v1303_v1 = vadd.f32 %v3533_v35, %v1302_v63 }
 0x362   : > { %1737 = vmatmul.bf16.gmra.mxu1 %v1632_v0  ;;  %v1175_v0 = vld [vmem:[%s3371_s13 + $0x30] sm:$0xff] }
 0x363   : > { %v1323_v3 = vmax.f32 %v1303_v1, 0.0  ;;  %v1605_v4 = vpop.f32.mrf.mxu0 }
 0x364   : > { %v1606_v6 = vadd.f32 %v3527_v32, %v1605_v4 }
 0x365   : > { %v1332_v5 = vpack.c.bf16 %v1323_v3, %v1322_v2 }
 0x366   : > { %v1624_v9 = vmax.f32 %v1606_v6, 0.0 }
 0x367   : > { %1436 = vmatmul.bf16.gmra.mxu3 %v1332_v5 }
 0x368   : > { %v1305_v7 = vpop.f32.mrf.mxu2 }
 0x369   : > { %v1306_v12 = vadd.f32 %v3533_v35, %v1305_v7  ;;  %v1176_v7 = vld [vmem:[%s3371_s13 + $0x38] sm:$0xff] }
 0x36b   : > { %v1607_v8 = vpop.f32.mrf.mxu0  ;;  %v1324_v16 = vmax.f32 %v1306_v12, 0.0 }
 0x36c   : > { %v1608_v10 = vadd.f32 %v3527_v32, %v1607_v8  ;;  %v3570_v32 = vld [vmem:[%s3804_s14] ss:$0 sm:$0xff] }
 0x36e   : > { %v1625_v11 = vmax.f32 %v1608_v10, 0.0 }
 0x370   : > { %v1307_v13 = vpop.f32.mrf.mxu2  ;;  %v1633_v14 = vpack.c.bf16 %v1625_v11, %v1624_v9 }
 0x371   : > { %v1308_v15 = vadd.f32 %v3533_v35, %v1307_v13  ;;  %v1177_v13 = vld [vmem:[%s3371_s13 + $0x40] sm:$0xff] }
 0x372   : > { %1742 = vmatmul.bf16.gmra.mxu1 %v1633_v14 }
 0x373   : > { %v1325_v17 = vmax.f32 %v1308_v15, 0.0 }
 0x375   : > { %v1333_v18 = vpack.c.bf16 %v1325_v17, %v1324_v16 }
 0x377   : > { %1441 = vmatmul.bf16.gmra.mxu3 %v1333_v18 }
 0x37f   : > { %v1708_v19 = vpop.f32.mrf.mxu1 }
 0x387   : > { %v1710_v20 = vpop.f32.mrf.mxu1 }
 0x38a   : > { %v1407_v22 = vpop.f32.mrf.mxu3 }
 0x38b   : > { %v1447_v23 = vadd.f32 %v1407_v22, %v1169_v21 }
 0x38d   : > { %v1467_v35 = vadd.f32 %v3570_v32, %v1447_v23 }
 0x38f   : > { %v1748_v25 = vadd.f32 %v1708_v19, %v1467_v35  ;;  %v1713_v26 = vpop.f32.mrf.mxu1 }
 0x391   : > { %v1769_v28 = vadd.f32 %v3576_v24, %v1748_v25 }
 0x392   : > { %v1409_v29 = vpop.f32.mrf.mxu3 }
 0x393   : > { %1785 = vst [vmem:[%s3413_s9] sm:$0xff] %v1769_v28  ;;  %v1448_v30 = vadd.f32 %v1409_v29, %v1170_v27  ;;  %v1179_v27 = vld [vmem:[%s3371_s13 + $0x50] sm:$0xff] }
 0x395   : > { %v1468_v31 = vadd.f32 %v3570_v32, %v1448_v30 }
 0x397   : > { %v1749_v33 = vadd.f32 %v1710_v20, %v1468_v31  ;;  %v1715_v34 = vpop.f32.mrf.mxu1  ;;  %v1178_v20 = vld [vmem:[%s3371_s13 + $0x48] sm:$0xff] }
 0x399   : > { %v1770_v37 = vadd.f32 %v3576_v24, %v1749_v33 }
 0x39a   : > { %v1412_v38 = vpop.f32.mrf.mxu3 }
 0x39b   : > { %1786 = vst [vmem:[%s3413_s9 + $0x8] sm:$0xff] %v1770_v37  ;;  %v1449_v39 = vadd.f32 %v1412_v38, %v1171_v36  ;;  %v1180_v36 = vld [vmem:[%s3371_s13 + $0x58] sm:$0xff] }
 0x39d   : > { %v1469_v40 = vadd.f32 %v3570_v32, %v1449_v39 }
 0x39f   : > { %v1750_v41 = vadd.f32 %v1713_v26, %v1469_v40  ;;  %v1718_v42 = vpop.f32.mrf.mxu1 }
 0x3a1   : > { %v1771_v44 = vadd.f32 %v3576_v24, %v1750_v41 }
 0x3a2   : > { %v1414_v45 = vpop.f32.mrf.mxu3 }
 0x3a3   : > { %1787 = vst [vmem:[%s3413_s9 + $0x10] sm:$0xff] %v1771_v44  ;;  %v1450_v46 = vadd.f32 %v1414_v45, %v1172_v43  ;;  %v1181_v43 = vld [vmem:[%s3371_s13 + $0x60] sm:$0xff] }
 0x3a5   : > { %v1470_v47 = vadd.f32 %v3570_v32, %v1450_v46 }
 0x3a7   : > { %v1751_v48 = vadd.f32 %v1715_v34, %v1470_v47  ;;  %v1720_v49 = vpop.f32.mrf.mxu1 }
 0x3a9   : > { %v1772_v51 = vadd.f32 %v3576_v24, %v1751_v48 }
 0x3aa   : > { %v1417_v52 = vpop.f32.mrf.mxu3 }
 0x3ab   : > { %1788 = vst [vmem:[%s3413_s9 + $0x18] sm:$0xff] %v1772_v51  ;;  %v1451_v53 = vadd.f32 %v1417_v52, %v1173_v50 }
 0x3ad   : > { %v1471_v54 = vadd.f32 %v3570_v32, %v1451_v53 }
 0x3af   : > { %v1752_v55 = vadd.f32 %v1718_v42, %v1471_v54  ;;  %v1723_v56 = vpop.f32.mrf.mxu1 }
 0x3b1   : > { %v1773_v58 = vadd.f32 %v3576_v24, %v1752_v55 }
 0x3b2   : > { %v1419_v59 = vpop.f32.mrf.mxu3 }
 0x3b3   : > { %1789 = vst [vmem:[%s3413_s9 + $0x20] sm:$0xff] %v1773_v58  ;;  %v1452_v60 = vadd.f32 %v1419_v59, %v1174_v57 }
 0x3b5   : > { %v1472_v61 = vadd.f32 %v3570_v32, %v1452_v60 }
 0x3b7   : > { %v1753_v62 = vadd.f32 %v1720_v49, %v1472_v61  ;;  %v1725_v63 = vpop.f32.mrf.mxu1  ;;  %v1182_v49 = vld [vmem:[%s3371_s13 + $0x68] sm:$0xff] }
 0x3b9   : > { %v1774_v1 = vadd.f32 %v3576_v24, %v1753_v62 }
 0x3ba   : > { %v1422_v2 = vpop.f32.mrf.mxu3 }
 0x3bb   : > { %1790 = vst [vmem:[%s3413_s9 + $0x28] sm:$0xff] %v1774_v1  ;;  %v1453_v3 = vadd.f32 %v1422_v2, %v1175_v0 }
 0x3bd   : > { %v1473_v4 = vadd.f32 %v3570_v32, %v1453_v3 }
 0x3bf   : > { %v1754_v5 = vadd.f32 %v1723_v56, %v1473_v4  ;;  %v1728_v6 = vpop.f32.mrf.mxu1  ;;  %v1183_v56 = vld [vmem:[%s3371_s13 + $0x70] sm:$0xff] }
 0x3c1   : > { %v1775_v8 = vadd.f32 %v3576_v24, %v1754_v5 }
 0x3c2   : > { %v1424_v9 = vpop.f32.mrf.mxu3 }
 0x3c3   : > { %1791 = vst [vmem:[%s3413_s9 + $0x30] sm:$0xff] %v1775_v8  ;;  %v1454_v10 = vadd.f32 %v1424_v9, %v1176_v7 }
 0x3c5   : > { %v1474_v11 = vadd.f32 %v3570_v32, %v1454_v10 }
 0x3c7   : > { %v1755_v12 = vadd.f32 %v1725_v63, %v1474_v11  ;;  %v1730_v15 = vpop.f32.mrf.mxu1  ;;  %v1184_v63 = vld [vmem:[%s3371_s13 + $0x78] sm:$0xff] }
 0x3c9   : > { %v1776_v14 = vadd.f32 %v3576_v24, %v1755_v12 }
 0x3ca   : > { %v1427_v16 = vpop.f32.mrf.mxu3 }
 0x3cb   : > { %1792 = vst [vmem:[%s3413_s9 + $0x38] sm:$0xff] %v1776_v14  ;;  %v1455_v17 = vadd.f32 %v1427_v16, %v1177_v13 }
 0x3cd   : > { %v1475_v18 = vadd.f32 %v3570_v32, %v1455_v17 }
 0x3cf   : > { %v1756_v19 = vadd.f32 %v1728_v6, %v1475_v18  ;;  %v1733_v35 = vpop.f32.mrf.mxu1 }
 0x3d1   : > { %v1777_v21 = vadd.f32 %v3576_v24, %v1756_v19 }
 0x3d2   : > { %v1429_v22 = vpop.f32.mrf.mxu3 }
 0x3d3   : > { %1793 = vst [vmem:[%s3413_s9 + $0x40] sm:$0xff] %v1777_v21  ;;  %v1456_v23 = vadd.f32 %v1429_v22, %v1178_v20 }
 0x3d5   : > { %v1476_v25 = vadd.f32 %v3570_v32, %v1456_v23 }
 0x3d7   : > { %v1757_v26 = vadd.f32 %v1730_v15, %v1476_v25  ;;  %v1735_v33 = vpop.f32.mrf.mxu1 }
 0x3d9   : > { %v1778_v28 = vadd.f32 %v3576_v24, %v1757_v26 }
 0x3da   : > { %v1432_v29 = vpop.f32.mrf.mxu3 }
 0x3db   : > { %1794 = vst [vmem:[%s3413_s9 + $0x48] sm:$0xff] %v1778_v28  ;;  %v1457_v30 = vadd.f32 %v1432_v29, %v1179_v27 }
 0x3dd   : > { %v1477_v31 = vadd.f32 %v3570_v32, %v1457_v30 }
 0x3df   : > { %v1758_v34 = vadd.f32 %v1733_v35, %v1477_v31  ;;  %v1738_v42 = vpop.f32.mrf.mxu1 }
 0x3e1   : > { %v1779_v37 = vadd.f32 %v3576_v24, %v1758_v34 }
 0x3e2   : > { %v1434_v38 = vpop.f32.mrf.mxu3 }
 0x3e3   : > { %1795 = vst [vmem:[%s3413_s9 + $0x50] sm:$0xff] %v1779_v37  ;;  %v1458_v39 = vadd.f32 %v1434_v38, %v1180_v36 }
 0x3e5   : > { %v1478_v40 = vadd.f32 %v3570_v32, %v1458_v39 }
 0x3e7   : > { %v1759_v41 = vadd.f32 %v1735_v33, %v1478_v40  ;;  %v1740_v51 = vpop.f32.mrf.mxu1 }
 0x3e9   : > { %v1780_v44 = vadd.f32 %v3576_v24, %v1759_v41 }
 0x3ea   : > { %v1437_v45 = vpop.f32.mrf.mxu3 }
 0x3eb   : > { %1796 = vst [vmem:[%s3413_s9 + $0x58] sm:$0xff] %v1780_v44  ;;  %v1459_v46 = vadd.f32 %v1437_v45, %v1181_v43 }
 0x3ed   : > { %v1479_v47 = vadd.f32 %v3570_v32, %v1459_v46 }
 0x3ef   : > { %v1760_v48 = vadd.f32 %v1738_v42, %v1479_v47  ;;  %v1743_v60 = vpop.f32.mrf.mxu1 }
 0x3f1   : > { %v1781_v50 = vadd.f32 %v3576_v24, %v1760_v48 }
 0x3f2   : > { %v1439_v52 = vpop.f32.mrf.mxu3 }
 0x3f3   : > { %1797 = vst [vmem:[%s3413_s9 + $0x60] sm:$0xff] %v1781_v50  ;;  %v1460_v53 = vadd.f32 %v1439_v52, %v1182_v49 }
 0x3f5   : > { %v1480_v54 = vadd.f32 %v3570_v32, %v1460_v53 }
 0x3f7   : > { %v1761_v55 = vadd.f32 %v1740_v51, %v1480_v54  ;;  %v1745_v4 = vpop.f32.mrf.mxu1 }
 0x3f9   : > { %v1782_v57 = vadd.f32 %v3576_v24, %v1761_v55 }
 0x3fa   : > { %v1442_v58 = vpop.f32.mrf.mxu3 }
 0x3fb   : > { %1798 = vst [vmem:[%s3413_s9 + $0x68] sm:$0xff] %v1782_v57  ;;  %v1461_v59 = vadd.f32 %v1442_v58, %v1183_v56 }
 0x3fd   : > { %v1481_v61 = vadd.f32 %v3570_v32, %v1461_v59 }
 0x3ff   : > { %v1762_v62 = vadd.f32 %v1743_v60, %v1481_v61 }
 0x401   : > { %v1783_v0 = vadd.f32 %v3576_v24, %v1762_v62 }
 0x402   : > { %v1444_v1 = vpop.f32.mrf.mxu3 }
 0x403   : > { %1799 = vst [vmem:[%s3413_s9 + $0x70] sm:$0xff] %v1783_v0  ;;  %v1462_v2 = vadd.f32 %v1444_v1, %v1184_v63 }
 0x405   : > { %v1482_v3 = vadd.f32 %v3570_v32, %v1462_v2 }
 0x407   : > { %v1763_v5 = vadd.f32 %v1745_v4, %v1482_v3 }
 0x409   : > { %v1784_v6 = vadd.f32 %v3576_v24, %v1763_v5 }
 0x40b   : > { %1800 = vst [vmem:[%s3413_s9 + $0x78] sm:$0xff] %v1784_v6 }
 0x40c PF: > { %s3806_s10 = sld [smem:[#allocation37_spill]]  ;;  %s1815_s23 = sshll.u32 %s3413_s9, 4  ;;  %s1816_s23 = int_to_ptr.vmem [resolvable:$true] %s1815_s23 }
 0x40d   : > { %s3809_s1 = sld [smem:[#allocation52_spill]]  ;;  %s1802_s14 = scalar_lea.sflag [#allocation9], %s483_s5 }
 0x412   : > { %p3807_p6 = scmp.ne.s32.totalorder %s3806_s10, 0 }
 0x413   : > { %s3810_s26 = smov %s3809_s1 }
 0x414   : > { %s2439_s13 = scalar_select %p3807_p6, [#allocation4], [#allocation22] }
 0x415   : > { %s3841_s20 = smov (!%p3807_p6, %s3126_s20), 0  ;;  %s2839_s9 = scalar_lea.hbm %s3810_s26, 384 }
 0x416   : > { %s1809_s2 = sld [smem:[%s2439_s13 + %s3841_s20]] }
 0x41c   : > { %s2382_s8 = sshll.u32 %s1809_s2, 7 }
 0x41d   : > { %s1814_s0 = scalar_lea.hbm %s3809_s1, %s2382_s8 }
 0x41e   : > { %s1817_s22 = sshll.u32 %s1814_s0, 4  ;;  %s1818_s22 = int_to_ptr.hbm [resolvable:$true] %s1817_s22 }
 0x41f   : > { %s2833_s16 = sshra.s32 %s1818_s22, 4  ;;  %s2834_s16 = int_to_ptr.hbm [resolvable:$true] %s2833_s16 }
 0x420   : > { %s2835_s15 = scalar_lea.hbm %s2834_s16, 128  ;;  %p2840_p10 = scmp.lt.s32.totalorder %s2834_s16, %s3810_s26 }
 0x421   : > { %p2836_p8 = scmp.ne.s32.totalorder %s2834_s16, %s2835_s15  ;;  %p2841_p5 = scmp.lt.s32.totalorder %s2839_s9, %s2835_s15 }
 0x423   : > { %p2837_p12 = pnand %p2836_p8, %p3807_p6  ;;  %p2842_p7 = por %p2841_p5, %p2840_p10 }
 0x425   : > { %p2838_p1 = pneg %p2837_p12 }
 0x427   : > { %p2843_p9 = pnand %p2842_p7, %p2838_p1 }
 0x429   : > { %2846 = shalt.err (!%p2843_p9)
}
 0x42a   : > { %s2989_s5 = smov 128   ;;  %s2990_s25 = smov 8  }
 0x42b   : > { %2441 = dma.vmem_to_hbm [thread:$0]  (%p3807_p6), %s1816_s23, 2048, %s1818_s22, %s1802_s14, %s2989_s5, %s2989_s5, %s2990_s25  }
 0x42c PF: > { %s3811_s8 = sld [smem:[#allocation33_spill]]  ;;  %p2480_p13 = scmp.ge.s32.totalorder %s2975_s19, 2 }
 0x42d   : > { %s3812_s21 = sld [smem:[#allocation38_spill]] }
 0x432   : > { %s1832_s3 = sand.u32 1, %s3811_s8  }
 0x433   : > { %p3813_p3 = scmp.ne.s32.totalorder %s3812_s21, 0  ;;  %s1833_s27 = scalar_lea.sflag [#allocation9], %s1832_s3 }
 0x435   : > { %p2470_p0 = pnand %p2480_p13, %p3813_p3 }
 0x437   : > { %p2471_p11 = pneg %p2470_p0 }
 0x439   : > { %2922 = dma.done.wait (%p2471_p11), %s1833_s27, 2048  }
 0x43a   : > { %2924 = vsyncadd (%p2471_p11), %s1833_s27, 4294965248  ;;  %s3814_s0 = sld [smem:[#allocation34_spill]]  ;;  %p47_p4 = scmp.ge.s32.totalorder %s3167_s24, 10  }
 0x43b   : > { %s3815_s16 = sld [smem:[#allocation43_spill]]  ;;  %s3819_s1 = smov %s2935_s29 }
 0x43c   : > { %s3816_s13 = sld [smem:[#allocation35_spill]]  ;;  %s3821_s2 = smov %s2943_s30 }
 0x43d   : > { %s3817_s14 = sld [smem:[#allocation36_spill]]  ;;  %s3822_s30 = smov %s2947_s12 }
 0x43e   : > { %s3818_s15 = sld [smem:[#allocation41_spill]]  ;;  %s3823_s12 = smov %s3337_s11 }
 0x43f   : > { %s3827_s19 = smov %s3167_s24  ;;  %49 = sbr.rel (!%p47_p4) target bundleno = 30 (0x1e), region = 149 }
 0x441   : > { %s3820_s29 = smov %s3815_s16  ;;  %s3824_s16 = smov %s2967_s17 }
 0x442   : > { %s3825_s17 = smov %s2971_s18  ;;  %s3826_s18 = smov %s3282_s28 }
 0x444   :  { %1839 = vsyncpa [#allocation8], 1 }
 0x445   :  { %1841 = vsyncpa [#allocation8 + $0x1], 1 }
 0x446   :  { %1842 = vsyncpa [#allocation11], 1 }
 0x447   :  { %1844 = vsyncpa [#allocation11 + $0x1], 1 }
 0x448   :  { %1845 = vsyncpa [#allocation14], 1 }
 0x449   :  { %1846 = vsyncpa [#allocation17], 1 }
 0x44a   :  { %1847 = vsyncpa [#allocation9], 1 }
 0x44b   :  { %1849 = vsyncpa [#allocation9 + $0x1], 1 }

</bundles_post_ra>
